<compile_context>
chip_gen: v7x
topology: tpu7x:2x2x1
jax: 0.10.0
libtpu: 0.0.40
codegen_flags: <defaults>
</compile_context>

<pallas_src>
import jax
import jax.numpy as jnp
from jax.experimental import pallas as pl
from jax.experimental.pallas import tpu as pltpu

# ----------------------------- model hyper-parameters -----------------------------
N_LAYERS = 2      # N identical layers (paper uses 6; small here)
D_MODEL  = 32     # layer.size
N_HEADS  = 4
D_FF     = 64
EPS      = 1e-6   # LayerNorm eps (module default)

BATCH = 2
SEQ   = 8

D_HEAD = D_MODEL // N_HEADS

# --------------------- packed parameter slab layout (rows, 128) ---------------------
PCOLS      = 4 * D_MODEL                 # 128 lanes -> lane-dense parameter DMA
ROW_QKV    = 0                           # rows [0, D)      : [wq*scale | wk | wv | wo]
ROW_W1     = D_MODEL                     # rows [D, 2D)     : w1 in cols [0, D_FF)
ROW_W2     = 2 * D_MODEL                 # rows [2D, 2D+F)  : w2 in cols [0, D)
ROW_VEC    = 2 * D_MODEL + D_FF          # 8 rows: bqkv, b1, ln1a, ln1b, ln2a, ln2b, bo, bff
LAYER_ROWS = ROW_VEC + 8                 # 136 rows per layer (multiple of 8 -> sublane aligned)
FIN_ROW    = N_LAYERS * LAYER_ROWS       # 2 trailing rows: Encoder.norm a2, b2
TOTAL_ROWS = FIN_ROW + 2                 # 274


def _layernorm(x, a, b):
    """a * (x - mean) / (std + eps) + b with unbiased std (matches torch .std default)."""
    d = x.shape[-1]
    mean = jnp.mean(x, axis=-1, keepdims=True)
    diff = x - mean
    var = jnp.sum(diff * diff, axis=-1, keepdims=True) * (1.0 / (d - 1))
    std = jnp.sqrt(var)
    return a * diff / (std + EPS) + b        # exact divide: tight parity with the reference


def encoder_kernel(xb_ref, p_ref, o_ref):
    T = BATCH * SEQ
    D = D_MODEL

    x = xb_ref[0:T, :]                          # (T, D) token rows (batch folded into sublanes)
    bias = xb_ref[T:T + BATCH, 0:SEQ]           # (B, S) additive attention bias (0 or -1e9)
    bias3 = bias[:, None, :]                    # (B, 1, S): broadcast over query positions

    for l in range(N_LAYERS):                   # static unroll (N_LAYERS is tiny)
        base = l * LAYER_ROWS
        wqkv = p_ref[base + ROW_QKV:base + ROW_QKV + D, 0:3 * D]        # (D, 3D), Q pre-scaled
        wo   = p_ref[base + ROW_QKV:base + ROW_QKV + D, 3 * D:4 * D]    # (D, D)
        w1   = p_ref[base + ROW_W1:base + ROW_W1 + D, 0:D_FF]           # (D, F)
        w2   = p_ref[base + ROW_W2:base + ROW_W2 + D_FF, 0:D]           # (F, D)
        vb = base + ROW_VEC
        bqkv = p_ref[vb + 0:vb + 1, 0:3 * D]    # (1, 3D)
        b1   = p_ref[vb + 1:vb + 2, 0:D_FF]
        ln1a = p_ref[vb + 2:vb + 3, 0:D]
        ln1b = p_ref[vb + 3:vb + 4, 0:D]
        ln2a = p_ref[vb + 4:vb + 5, 0:D]
        ln2b = p_ref[vb + 5:vb + 6, 0:D]
        bo   = p_ref[vb + 6:vb + 7, 0:D]
        bff  = p_ref[vb + 7:vb + 8, 0:D]

        # -------- sublayer 1: multi-head self-attention (pre-norm residual) --------
        y = _layernorm(x, ln1a, ln1b)
        qkv = jnp.dot(y, wqkv, preferred_element_type=jnp.float32) + bqkv    # (T, 3D)

        head_outs = []
        for h in range(N_HEADS):                # static head loop; batch handled by einsum
            c = h * D_HEAD
            qh = qkv[:, c:c + D_HEAD].reshape(BATCH, SEQ, D_HEAD)            # free leading split
            kh = qkv[:, D + c:D + c + D_HEAD].reshape(BATCH, SEQ, D_HEAD)
            vh = qkv[:, 2 * D + c:2 * D + c + D_HEAD].reshape(BATCH, SEQ, D_HEAD)
            s = jnp.einsum('bqd,bkd->bqk', qh, kh,
                           preferred_element_type=jnp.float32)               # (B, S, S)
            s = s + bias3                                                    # masked_fill(-1e9)
            s = s - jnp.max(s, axis=-1, keepdims=True)                       # stable softmax
            p = jnp.exp(s)
            p = p * pl.reciprocal(jnp.sum(p, axis=-1, keepdims=True), approx=True)
            head_outs.append(jnp.einsum('bqk,bkd->bqd', p, vh,
                                        preferred_element_type=jnp.float32)) # (B, S, dh)
        attn = jnp.concatenate(head_outs, axis=-1).reshape(T, D)             # lane concat
        x = x + jnp.dot(attn, wo, preferred_element_type=jnp.float32) + bo   # single out-proj

        # -------- sublayer 2: position-wise feed-forward (pre-norm residual) --------
        y = _layernorm(x, ln2a, ln2b)
        h1 = jnp.dot(y, w1, preferred_element_type=jnp.float32) + b1
        h1 = jnp.maximum(h1, 0.0)                                            # ReLU
        x = x + jnp.dot(h1, w2, preferred_element_type=jnp.float32) + bff

    # -------- final Encoder.norm --------
    fa = p_ref[FIN_ROW:FIN_ROW + 1, 0:D]
    fb = p_ref[FIN_ROW + 1:FIN_ROW + 2, 0:D]
    o_ref[...] = _layernorm(x, fa, fb)


@jax.jit
def encoder_forward(x, mask, param_slab):
    B, S, D = x.shape
    assert S <= D, "bias rows are padded into the D-wide activation slab"
    # Additive attention bias precomputed outside the kernel (cheap XLA op), then folded
    # into the activation slab so the pallas_call has exactly 2 inputs and 1 output.
    bias = jnp.where(mask.reshape(B, S) == 0, jnp.float32(-1e9), jnp.float32(0.0))
    xb = jnp.concatenate(
        [x.reshape(B * S, D).astype(jnp.float32),        # free contiguous collapse
         jnp.pad(bias, ((0, 0), (0, D - S)))],
        axis=0)                                          # (B*S + B, D)

    out = pl.pallas_call(
        encoder_kernel,
        out_shape=jax.ShapeDtypeStruct((B * S, D), jnp.float32),
        in_specs=[pl.BlockSpec(memory_space=pltpu.MemorySpace.VMEM),
                  pl.BlockSpec(memory_space=pltpu.MemorySpace.VMEM)],
        out_specs=pl.BlockSpec(memory_space=pltpu.MemorySpace.VMEM),
    )(xb, param_slab)                                    # no grid: single invocation, all gens
    return out.reshape(B, S, D)


def init_params(key):
    """Deterministic synthetic parameters with the shapes implied by the module."""
    ks = jax.random.split(key, 8)
    w = lambda k, shape: (0.02 * jax.random.normal(k, shape)).astype(jnp.float32)
    zeros = lambda shape: jnp.zeros(shape, jnp.float32)
    ones = lambda shape: jnp.ones(shape, jnp.float32)

    wq = w(ks[0], (N_LAYERS, D_MODEL, D_MODEL)); bq = zeros((N_LAYERS, D_MODEL))
    wk = w(ks[1], (N_LAYERS, D_MODEL, D_MODEL)); bk = zeros((N_LAYERS, D_MODEL))
    wv = w(ks[2], (N_LAYERS, D_MODEL, D_MODEL)); bv = zeros((N_LAYERS, D_MODEL))
    wo = w(ks[3], (N_LAYERS, D_MODEL, D_MODEL)); bo = zeros((N_LAYERS, D_MODEL))
    ln1a = ones((N_LAYERS, D_MODEL)); ln1b = zeros((N_LAYERS, D_MODEL))
    ln2a = ones((N_LAYERS, D_MODEL)); ln2b = zeros((N_LAYERS, D_MODEL))
    w1 = w(ks[4], (N_LAYERS, D_MODEL, D_FF));  b1 = zeros((N_LAYERS, D_FF))
    w2 = w(ks[5], (N_LAYERS, D_FF, D_MODEL));  b2 = zeros((N_LAYERS, D_MODEL))
    fa = ones((D_MODEL,)); fb = zeros((D_MODEL,))          # Encoder.norm (a2, b2)

    return dict(wq=wq, bq=bq, wk=wk, bk=bk, wv=wv, bv=bv, wo=wo, bo=bo,
                ln1a=ln1a, ln1b=ln1b, ln2a=ln2a, ln2b=ln2b,
                w1=w1, b1=b1, w2=w2, b2=b2, fa=fa, fb=fb)


def pack_params(p):
    """Pack all 18 module parameters into ONE lane-dense (TOTAL_ROWS, 128) f32 slab.

    The 1/sqrt(d_head) attention scale is folded into the Q projection weight/bias here
    (one-time host-side weight transform) so the kernel never multiplies by it.
    """
    D, F = D_MODEL, D_FF
    scale = float(D_HEAD) ** -0.5
    pad_cols = lambda a, c: jnp.pad(a, ((0, 0), (0, PCOLS - c)))
    pad_row  = lambda v, c: jnp.pad(v, (0, PCOLS - c))

    blocks = []
    for l in range(N_LAYERS):
        wqkv = jnp.concatenate([p["wq"][l] * scale, p["wk"][l], p["wv"][l]], axis=1)  # (D,3D)
        blocks.append(jnp.concatenate([wqkv, p["wo"][l]], axis=1))      # (D, 4D) == (D, 128)
        blocks.append(pad_cols(p["w1"][l], F))                          # (D, 128)
        blocks.append(pad_cols(p["w2"][l], D))                          # (F, 128)
        bqkv = jnp.concatenate([p["bq"][l] * scale, p["bk"][l], p["bv"][l]])
        blocks.append(jnp.stack([
            pad_row(bqkv, 3 * D),
            pad_row(p["b1"][l], F),
            pad_row(p["ln1a"][l], D), pad_row(p["ln1b"][l], D),
            pad_row(p["ln2a"][l], D), pad_row(p["ln2b"][l], D),
            pad_row(p["bo"][l], D),   pad_row(p["b2"][l], D),
        ], axis=0))                                                     # (8, 128)
    blocks.append(jnp.stack([pad_row(p["fa"], D), pad_row(p["fb"], D)], axis=0))  # (2, 128)
    slab = jnp.concatenate(blocks, axis=0)
    assert slab.shape == (TOTAL_ROWS, PCOLS)
    return slab


def encoder_ref(x, mask, p):
    """Pure-JAX reference mirroring the PyTorch module (pre-norm encoder, unbiased-std LN)."""
    def ln(v, a, b):
        mean = v.mean(-1, keepdims=True)
        var = ((v - mean) ** 2).sum(-1, keepdims=True) / (v.shape[-1] - 1)
        return a * (v - mean) / (jnp.sqrt(var) + EPS) + b

    B, S, D = x.shape
    H, dh = N_HEADS, D_HEAD
    m = mask[:, None, :, :]                               # (B, 1, 1, S)
    for l in range(N_LAYERS):
        y = ln(x, p["ln1a"][l], p["ln1b"][l])
        q = (y @ p["wq"][l] + p["bq"][l]).reshape(B, S, H, dh).transpose(0, 2, 1, 3)
        k = (y @ p["wk"][l] + p["bk"][l]).reshape(B, S, H, dh).transpose(0, 2, 1, 3)
        v = (y @ p["wv"][l] + p["bv"][l]).reshape(B, S, H, dh).transpose(0, 2, 1, 3)
        s = jnp.einsum('bhqd,bhkd->bhqk', q, k) / jnp.sqrt(float(dh))
        s = jnp.where(m == 0, -1e9, s)
        a = jax.nn.softmax(s, axis=-1)
        o = jnp.einsum('bhqk,bhkd->bhqd', a, v).transpose(0, 2, 1, 3).reshape(B, S, D)
        x = x + o @ p["wo"][l] + p["bo"][l]
        y = ln(x, p["ln2a"][l], p["ln2b"][l])
        h1 = jax.nn.relu(y @ p["w1"][l] + p["b1"][l])
        x = x + h1 @ p["w2"][l] + p["b2"][l]
    return ln(x, p["fa"], p["fb"])


if __name__ == "__main__":
    key = jax.random.PRNGKey(0)
    kx, kp = jax.random.split(key)

    x = jax.random.normal(kx, (BATCH, SEQ, D_MODEL), dtype=jnp.float32)
    mask = jnp.ones((BATCH, 1, SEQ), dtype=jnp.float32)     # all positions visible
    params = init_params(kp)
    slab = pack_params(params)

    out = encoder_forward(x, mask, slab)
    out = jax.block_until_ready(out)

    assert out.shape == (BATCH, SEQ, D_MODEL)
    assert bool(jnp.all(jnp.isfinite(out)))

    ref = encoder_ref(x, mask, params)
    assert bool(jnp.allclose(out, ref, rtol=2e-2, atol=2e-2)), \
        f"max |diff| = {float(jnp.max(jnp.abs(out - ref)))}"

    # TODO(synk): dropout inside the encoder layers is train-time only; inference forward = identity.
    print("KERNEL_OK")
</pallas_src>

<mosaic_0001>
module attributes {stable_mosaic.version = 11 : i64} {
  func.func @encoder_kernel(%arg0: memref<18x32xf32, #tpu.memory_space<vmem>>, %arg1: memref<274x128xf32, #tpu.memory_space<vmem>>, %arg2: memref<16x32xf32, #tpu.memory_space<vmem>>) attributes {dimension_semantics = [], scalar_prefetch = 0 : i64, scratch_operands = 0 : i64, tpu.core_type = #tpu.core_type<tc>} {
    %c0 = arith.constant 0 : index
    %c0_0 = arith.constant 0 : index
    %0 = vector.load %arg0[%c0, %c0_0] : memref<18x32xf32, #tpu.memory_space<vmem>>, vector<16x32xf32>
    %c16 = arith.constant 16 : index
    %c0_1 = arith.constant 0 : index
    %1 = vector.load %arg0[%c16, %c0_1] : memref<18x32xf32, #tpu.memory_space<vmem>>, vector<2x8xf32>
    %2 = vector.shape_cast %1 : vector<2x8xf32> to vector<2x1x8xf32>
    %c0_2 = arith.constant 0 : index
    %c0_3 = arith.constant 0 : index
    %3 = vector.load %arg1[%c0_2, %c0_3] : memref<274x128xf32, #tpu.memory_space<vmem>>, vector<32x96xf32>
    %c0_4 = arith.constant 0 : index
    %c96 = arith.constant 96 : index
    %4 = vector.load %arg1[%c0_4, %c96] : memref<274x128xf32, #tpu.memory_space<vmem>>, vector<32x32xf32>
    %c32 = arith.constant 32 : index
    %c0_5 = arith.constant 0 : index
    %5 = vector.load %arg1[%c32, %c0_5] : memref<274x128xf32, #tpu.memory_space<vmem>>, vector<32x64xf32>
    %c64 = arith.constant 64 : index
    %c0_6 = arith.constant 0 : index
    %6 = vector.load %arg1[%c64, %c0_6] : memref<274x128xf32, #tpu.memory_space<vmem>>, vector<64x32xf32>
    %c128 = arith.constant 128 : index
    %c0_7 = arith.constant 0 : index
    %7 = vector.load %arg1[%c128, %c0_7] : memref<274x128xf32, #tpu.memory_space<vmem>>, vector<1x96xf32>
    %c129 = arith.constant 129 : index
    %c0_8 = arith.constant 0 : index
    %8 = vector.load %arg1[%c129, %c0_8] : memref<274x128xf32, #tpu.memory_space<vmem>>, vector<1x64xf32>
    %c130 = arith.constant 130 : index
    %c0_9 = arith.constant 0 : index
    %9 = vector.load %arg1[%c130, %c0_9] : memref<274x128xf32, #tpu.memory_space<vmem>>, vector<1x32xf32>
    %c131 = arith.constant 131 : index
    %c0_10 = arith.constant 0 : index
    %10 = vector.load %arg1[%c131, %c0_10] : memref<274x128xf32, #tpu.memory_space<vmem>>, vector<1x32xf32>
    %c132 = arith.constant 132 : index
    %c0_11 = arith.constant 0 : index
    %11 = vector.load %arg1[%c132, %c0_11] : memref<274x128xf32, #tpu.memory_space<vmem>>, vector<1x32xf32>
    %c133 = arith.constant 133 : index
    %c0_12 = arith.constant 0 : index
    %12 = vector.load %arg1[%c133, %c0_12] : memref<274x128xf32, #tpu.memory_space<vmem>>, vector<1x32xf32>
    %c134 = arith.constant 134 : index
    %c0_13 = arith.constant 0 : index
    %13 = vector.load %arg1[%c134, %c0_13] : memref<274x128xf32, #tpu.memory_space<vmem>>, vector<1x32xf32>
    %c135 = arith.constant 135 : index
    %c0_14 = arith.constant 0 : index
    %14 = vector.load %arg1[%c135, %c0_14] : memref<274x128xf32, #tpu.memory_space<vmem>>, vector<1x32xf32>
    %cst = arith.constant dense<0.000000e+00> : vector<16xf32>
    %15 = vector.multi_reduction <add>, %0, %cst [1] : vector<16x32xf32> to vector<16xf32>
    %16 = vector.shape_cast %15 : vector<16xf32> to vector<16x1xf32>
    %cst_15 = arith.constant 3.200000e+01 : f32
    %17 = vector.broadcast %cst_15 : f32 to vector<16x1xf32>
    %18 = arith.divf %16, %17 : vector<16x1xf32>
    %19 = vector.broadcast %18 : vector<16x1xf32> to vector<16x32xf32>
    %20 = arith.subf %0, %19 : vector<16x32xf32>
    %21 = arith.mulf %20, %20 : vector<16x32xf32>
    %cst_16 = arith.constant dense<0.000000e+00> : vector<16xf32>
    %22 = vector.multi_reduction <add>, %21, %cst_16 [1] : vector<16x32xf32> to vector<16xf32>
    %23 = vector.shape_cast %22 : vector<16xf32> to vector<16x1xf32>
    %cst_17 = arith.constant 0.0322580636 : f32
    %24 = vector.broadcast %cst_17 : f32 to vector<16x1xf32>
    %25 = arith.mulf %23, %24 : vector<16x1xf32>
    %26 = math.sqrt %25 : vector<16x1xf32>
    %27 = vector.broadcast %9 : vector<1x32xf32> to vector<16x32xf32>
    %28 = arith.mulf %27, %20 : vector<16x32xf32>
    %cst_18 = arith.constant 9.99999997E-7 : f32
    %29 = vector.broadcast %cst_18 : f32 to vector<16x1xf32>
    %30 = arith.addf %26, %29 : vector<16x1xf32>
    %31 = vector.broadcast %30 : vector<16x1xf32> to vector<16x32xf32>
    %32 = arith.divf %28, %31 : vector<16x32xf32>
    %33 = vector.broadcast %10 : vector<1x32xf32> to vector<16x32xf32>
    %34 = arith.addf %32, %33 : vector<16x32xf32>
    %cst_19 = arith.constant dense<0.000000e+00> : vector<16x96xf32>
    %35 = tpu.matmul %34, %3, %cst_19 {dimension_numbers = #tpu.dot_dimension_numbers<[1], [0], [0], [1], [0, 0, 1, 1], [], []>} : vector<16x32xf32>, vector<32x96xf32>, vector<16x96xf32> -> vector<16x96xf32>
    %36 = vector.broadcast %7 : vector<1x96xf32> to vector<16x96xf32>
    %37 = arith.addf %35, %36 : vector<16x96xf32>
    %38 = vector.extract_strided_slice %37 {offsets = [0, 0], sizes = [16, 8], strides = [1, 1]} : vector<16x96xf32> to vector<16x8xf32>
    %39 = vector.shape_cast %38 : vector<16x8xf32> to vector<2x8x8xf32>
    %40 = vector.extract_strided_slice %37 {offsets = [0, 32], sizes = [16, 8], strides = [1, 1]} : vector<16x96xf32> to vector<16x8xf32>
    %41 = vector.shape_cast %40 : vector<16x8xf32> to vector<2x8x8xf32>
    %42 = vector.extract_strided_slice %37 {offsets = [0, 64], sizes = [16, 8], strides = [1, 1]} : vector<16x96xf32> to vector<16x8xf32>
    %43 = vector.shape_cast %42 : vector<16x8xf32> to vector<2x8x8xf32>
    "tpu.trace_start"() <{level = 10 : i32, message = "bqd,bkd->bqk"}> : () -> ()
    %cst_20 = arith.constant dense<0.000000e+00> : vector<2x8x8xf32>
    %44 = tpu.matmul %39, %41, %cst_20 {dimension_numbers = #tpu.dot_dimension_numbers<[2], [2], [1], [1], [0, 0, 0, 1, 1, 1], [0], [0]>} : vector<2x8x8xf32>, vector<2x8x8xf32>, vector<2x8x8xf32> -> vector<2x8x8xf32>
    "tpu.trace_stop"() : () -> ()
    %45 = vector.broadcast %2 : vector<2x1x8xf32> to vector<2x8x8xf32>
    %46 = arith.addf %44, %45 : vector<2x8x8xf32>
    %cst_21 = arith.constant dense<0xFF800000> : vector<2x8xf32>
    %47 = vector.multi_reduction <maximumf>, %46, %cst_21 [2] : vector<2x8x8xf32> to vector<2x8xf32>
    %48 = vector.shape_cast %47 : vector<2x8xf32> to vector<2x8x1xf32>
    %49 = vector.broadcast %48 : vector<2x8x1xf32> to vector<2x8x8xf32>
    %50 = arith.subf %46, %49 : vector<2x8x8xf32>
    %51 = math.exp %50 : vector<2x8x8xf32>
    %cst_22 = arith.constant dense<0.000000e+00> : vector<2x8xf32>
    %52 = vector.multi_reduction <add>, %51, %cst_22 [2] : vector<2x8x8xf32> to vector<2x8xf32>
    %53 = vector.shape_cast %52 : vector<2x8xf32> to vector<2x8x1xf32>
    %54 = tpu.reciprocal %53 {approx = true} : vector<2x8x1xf32> -> vector<2x8x1xf32>
    %55 = vector.broadcast %54 : vector<2x8x1xf32> to vector<2x8x8xf32>
    %56 = arith.mulf %51, %55 : vector<2x8x8xf32>
    "tpu.trace_start"() <{level = 10 : i32, message = "bqk,bkd->bqd"}> : () -> ()
    %cst_23 = arith.constant dense<0.000000e+00> : vector<2x8x8xf32>
    %57 = tpu.matmul %56, %43, %cst_23 {dimension_numbers = #tpu.dot_dimension_numbers<[2], [1], [1], [2], [0, 0, 0, 1, 1, 2], [0], [0]>} : vector<2x8x8xf32>, vector<2x8x8xf32>, vector<2x8x8xf32> -> vector<2x8x8xf32>
    "tpu.trace_stop"() : () -> ()
    %58 = vector.extract_strided_slice %37 {offsets = [0, 8], sizes = [16, 8], strides = [1, 1]} : vector<16x96xf32> to vector<16x8xf32>
    %59 = vector.shape_cast %58 : vector<16x8xf32> to vector<2x8x8xf32>
    %60 = vector.extract_strided_slice %37 {offsets = [0, 40], sizes = [16, 8], strides = [1, 1]} : vector<16x96xf32> to vector<16x8xf32>
    %61 = vector.shape_cast %60 : vector<16x8xf32> to vector<2x8x8xf32>
    %62 = vector.extract_strided_slice %37 {offsets = [0, 72], sizes = [16, 8], strides = [1, 1]} : vector<16x96xf32> to vector<16x8xf32>
    %63 = vector.shape_cast %62 : vector<16x8xf32> to vector<2x8x8xf32>
    "tpu.trace_start"() <{level = 10 : i32, message = "bqd,bkd->bqk"}> : () -> ()
    %cst_24 = arith.constant dense<0.000000e+00> : vector<2x8x8xf32>
    %64 = tpu.matmul %59, %61, %cst_24 {dimension_numbers = #tpu.dot_dimension_numbers<[2], [2], [1], [1], [0, 0, 0, 1, 1, 1], [0], [0]>} : vector<2x8x8xf32>, vector<2x8x8xf32>, vector<2x8x8xf32> -> vector<2x8x8xf32>
    "tpu.trace_stop"() : () -> ()
    %65 = vector.broadcast %2 : vector<2x1x8xf32> to vector<2x8x8xf32>
    %66 = arith.addf %64, %65 : vector<2x8x8xf32>
    %cst_25 = arith.constant dense<0xFF800000> : vector<2x8xf32>
    %67 = vector.multi_reduction <maximumf>, %66, %cst_25 [2] : vector<2x8x8xf32> to vector<2x8xf32>
    %68 = vector.shape_cast %67 : vector<2x8xf32> to vector<2x8x1xf32>
    %69 = vector.broadcast %68 : vector<2x8x1xf32> to vector<2x8x8xf32>
    %70 = arith.subf %66, %69 : vector<2x8x8xf32>
    %71 = math.exp %70 : vector<2x8x8xf32>
    %cst_26 = arith.constant dense<0.000000e+00> : vector<2x8xf32>
    %72 = vector.multi_reduction <add>, %71, %cst_26 [2] : vector<2x8x8xf32> to vector<2x8xf32>
    %73 = vector.shape_cast %72 : vector<2x8xf32> to vector<2x8x1xf32>
    %74 = tpu.reciprocal %73 {approx = true} : vector<2x8x1xf32> -> vector<2x8x1xf32>
    %75 = vector.broadcast %74 : vector<2x8x1xf32> to vector<2x8x8xf32>
    %76 = arith.mulf %71, %75 : vector<2x8x8xf32>
    "tpu.trace_start"() <{level = 10 : i32, message = "bqk,bkd->bqd"}> : () -> ()
    %cst_27 = arith.constant dense<0.000000e+00> : vector<2x8x8xf32>
    %77 = tpu.matmul %76, %63, %cst_27 {dimension_numbers = #tpu.dot_dimension_numbers<[2], [1], [1], [2], [0, 0, 0, 1, 1, 2], [0], [0]>} : vector<2x8x8xf32>, vector<2x8x8xf32>, vector<2x8x8xf32> -> vector<2x8x8xf32>
    "tpu.trace_stop"() : () -> ()
    %78 = vector.extract_strided_slice %37 {offsets = [0, 16], sizes = [16, 8], strides = [1, 1]} : vector<16x96xf32> to vector<16x8xf32>
    %79 = vector.shape_cast %78 : vector<16x8xf32> to vector<2x8x8xf32>
    %80 = vector.extract_strided_slice %37 {offsets = [0, 48], sizes = [16, 8], strides = [1, 1]} : vector<16x96xf32> to vector<16x8xf32>
    %81 = vector.shape_cast %80 : vector<16x8xf32> to vector<2x8x8xf32>
    %82 = vector.extract_strided_slice %37 {offsets = [0, 80], sizes = [16, 8], strides = [1, 1]} : vector<16x96xf32> to vector<16x8xf32>
    %83 = vector.shape_cast %82 : vector<16x8xf32> to vector<2x8x8xf32>
    "tpu.trace_start"() <{level = 10 : i32, message = "bqd,bkd->bqk"}> : () -> ()
    %cst_28 = arith.constant dense<0.000000e+00> : vector<2x8x8xf32>
    %84 = tpu.matmul %79, %81, %cst_28 {dimension_numbers = #tpu.dot_dimension_numbers<[2], [2], [1], [1], [0, 0, 0, 1, 1, 1], [0], [0]>} : vector<2x8x8xf32>, vector<2x8x8xf32>, vector<2x8x8xf32> -> vector<2x8x8xf32>
    "tpu.trace_stop"() : () -> ()
    %85 = vector.broadcast %2 : vector<2x1x8xf32> to vector<2x8x8xf32>
    %86 = arith.addf %84, %85 : vector<2x8x8xf32>
    %cst_29 = arith.constant dense<0xFF800000> : vector<2x8xf32>
    %87 = vector.multi_reduction <maximumf>, %86, %cst_29 [2] : vector<2x8x8xf32> to vector<2x8xf32>
    %88 = vector.shape_cast %87 : vector<2x8xf32> to vector<2x8x1xf32>
    %89 = vector.broadcast %88 : vector<2x8x1xf32> to vector<2x8x8xf32>
    %90 = arith.subf %86, %89 : vector<2x8x8xf32>
    %91 = math.exp %90 : vector<2x8x8xf32>
    %cst_30 = arith.constant dense<0.000000e+00> : vector<2x8xf32>
    %92 = vector.multi_reduction <add>, %91, %cst_30 [2] : vector<2x8x8xf32> to vector<2x8xf32>
    %93 = vector.shape_cast %92 : vector<2x8xf32> to vector<2x8x1xf32>
    %94 = tpu.reciprocal %93 {approx = true} : vector<2x8x1xf32> -> vector<2x8x1xf32>
    %95 = vector.broadcast %94 : vector<2x8x1xf32> to vector<2x8x8xf32>
    %96 = arith.mulf %91, %95 : vector<2x8x8xf32>
    "tpu.trace_start"() <{level = 10 : i32, message = "bqk,bkd->bqd"}> : () -> ()
    %cst_31 = arith.constant dense<0.000000e+00> : vector<2x8x8xf32>
    %97 = tpu.matmul %96, %83, %cst_31 {dimension_numbers = #tpu.dot_dimension_numbers<[2], [1], [1], [2], [0, 0, 0, 1, 1, 2], [0], [0]>} : vector<2x8x8xf32>, vector<2x8x8xf32>, vector<2x8x8xf32> -> vector<2x8x8xf32>
    "tpu.trace_stop"() : () -> ()
    %98 = vector.extract_strided_slice %37 {offsets = [0, 24], sizes = [16, 8], strides = [1, 1]} : vector<16x96xf32> to vector<16x8xf32>
    %99 = vector.shape_cast %98 : vector<16x8xf32> to vector<2x8x8xf32>
    %100 = vector.extract_strided_slice %37 {offsets = [0, 56], sizes = [16, 8], strides = [1, 1]} : vector<16x96xf32> to vector<16x8xf32>
    %101 = vector.shape_cast %100 : vector<16x8xf32> to vector<2x8x8xf32>
    %102 = vector.extract_strided_slice %37 {offsets = [0, 88], sizes = [16, 8], strides = [1, 1]} : vector<16x96xf32> to vector<16x8xf32>
    %103 = vector.shape_cast %102 : vector<16x8xf32> to vector<2x8x8xf32>
    "tpu.trace_start"() <{level = 10 : i32, message = "bqd,bkd->bqk"}> : () -> ()
    %cst_32 = arith.constant dense<0.000000e+00> : vector<2x8x8xf32>
    %104 = tpu.matmul %99, %101, %cst_32 {dimension_numbers = #tpu.dot_dimension_numbers<[2], [2], [1], [1], [0, 0, 0, 1, 1, 1], [0], [0]>} : vector<2x8x8xf32>, vector<2x8x8xf32>, vector<2x8x8xf32> -> vector<2x8x8xf32>
    "tpu.trace_stop"() : () -> ()
    %105 = vector.broadcast %2 : vector<2x1x8xf32> to vector<2x8x8xf32>
    %106 = arith.addf %104, %105 : vector<2x8x8xf32>
    %cst_33 = arith.constant dense<0xFF800000> : vector<2x8xf32>
    %107 = vector.multi_reduction <maximumf>, %106, %cst_33 [2] : vector<2x8x8xf32> to vector<2x8xf32>
    %108 = vector.shape_cast %107 : vector<2x8xf32> to vector<2x8x1xf32>
    %109 = vector.broadcast %108 : vector<2x8x1xf32> to vector<2x8x8xf32>
    %110 = arith.subf %106, %109 : vector<2x8x8xf32>
    %111 = math.exp %110 : vector<2x8x8xf32>
    %cst_34 = arith.constant dense<0.000000e+00> : vector<2x8xf32>
    %112 = vector.multi_reduction <add>, %111, %cst_34 [2] : vector<2x8x8xf32> to vector<2x8xf32>
    %113 = vector.shape_cast %112 : vector<2x8xf32> to vector<2x8x1xf32>
    %114 = tpu.reciprocal %113 {approx = true} : vector<2x8x1xf32> -> vector<2x8x1xf32>
    %115 = vector.broadcast %114 : vector<2x8x1xf32> to vector<2x8x8xf32>
    %116 = arith.mulf %111, %115 : vector<2x8x8xf32>
    "tpu.trace_start"() <{level = 10 : i32, message = "bqk,bkd->bqd"}> : () -> ()
    %cst_35 = arith.constant dense<0.000000e+00> : vector<2x8x8xf32>
    %117 = tpu.matmul %116, %103, %cst_35 {dimension_numbers = #tpu.dot_dimension_numbers<[2], [1], [1], [2], [0, 0, 0, 1, 1, 2], [0], [0]>} : vector<2x8x8xf32>, vector<2x8x8xf32>, vector<2x8x8xf32> -> vector<2x8x8xf32>
    "tpu.trace_stop"() : () -> ()
    %118 = tpu.concatenate %57, %77, %97, %117 in 2 : vector<2x8x8xf32>, vector<2x8x8xf32>, vector<2x8x8xf32>, vector<2x8x8xf32> -> vector<2x8x32xf32>
    %119 = vector.shape_cast %118 : vector<2x8x32xf32> to vector<16x32xf32>
    %cst_36 = arith.constant dense<0.000000e+00> : vector<16x32xf32>
    %120 = tpu.matmul %119, %4, %cst_36 {dimension_numbers = #tpu.dot_dimension_numbers<[1], [0], [0], [1], [0, 0, 1, 1], [], []>} : vector<16x32xf32>, vector<32x32xf32>, vector<16x32xf32> -> vector<16x32xf32>
    %121 = arith.addf %0, %120 : vector<16x32xf32>
    %122 = vector.broadcast %13 : vector<1x32xf32> to vector<16x32xf32>
    %123 = arith.addf %121, %122 : vector<16x32xf32>
    %cst_37 = arith.constant dense<0.000000e+00> : vector<16xf32>
    %124 = vector.multi_reduction <add>, %123, %cst_37 [1] : vector<16x32xf32> to vector<16xf32>
    %125 = vector.shape_cast %124 : vector<16xf32> to vector<16x1xf32>
    %cst_38 = arith.constant 3.200000e+01 : f32
    %126 = vector.broadcast %cst_38 : f32 to vector<16x1xf32>
    %127 = arith.divf %125, %126 : vector<16x1xf32>
    %128 = vector.broadcast %127 : vector<16x1xf32> to vector<16x32xf32>
    %129 = arith.subf %123, %128 : vector<16x32xf32>
    %130 = arith.mulf %129, %129 : vector<16x32xf32>
    %cst_39 = arith.constant dense<0.000000e+00> : vector<16xf32>
    %131 = vector.multi_reduction <add>, %130, %cst_39 [1] : vector<16x32xf32> to vector<16xf32>
    %132 = vector.shape_cast %131 : vector<16xf32> to vector<16x1xf32>
    %cst_40 = arith.constant 0.0322580636 : f32
    %133 = vector.broadcast %cst_40 : f32 to vector<16x1xf32>
    %134 = arith.mulf %132, %133 : vector<16x1xf32>
    %135 = math.sqrt %134 : vector<16x1xf32>
    %136 = vector.broadcast %11 : vector<1x32xf32> to vector<16x32xf32>
    %137 = arith.mulf %136, %129 : vector<16x32xf32>
    %cst_41 = arith.constant 9.99999997E-7 : f32
    %138 = vector.broadcast %cst_41 : f32 to vector<16x1xf32>
    %139 = arith.addf %135, %138 : vector<16x1xf32>
    %140 = vector.broadcast %139 : vector<16x1xf32> to vector<16x32xf32>
    %141 = arith.divf %137, %140 : vector<16x32xf32>
    %142 = vector.broadcast %12 : vector<1x32xf32> to vector<16x32xf32>
    %143 = arith.addf %141, %142 : vector<16x32xf32>
    %cst_42 = arith.constant dense<0.000000e+00> : vector<16x64xf32>
    %144 = tpu.matmul %143, %5, %cst_42 {dimension_numbers = #tpu.dot_dimension_numbers<[1], [0], [0], [1], [0, 0, 1, 1], [], []>} : vector<16x32xf32>, vector<32x64xf32>, vector<16x64xf32> -> vector<16x64xf32>
    %145 = vector.broadcast %8 : vector<1x64xf32> to vector<16x64xf32>
    %146 = arith.addf %144, %145 : vector<16x64xf32>
    %cst_43 = arith.constant 0.000000e+00 : f32
    %147 = vector.broadcast %cst_43 : f32 to vector<16x64xf32>
    %148 = arith.maximumf %146, %147 : vector<16x64xf32>
    %cst_44 = arith.constant dense<0.000000e+00> : vector<16x32xf32>
    %149 = tpu.matmul %148, %6, %cst_44 {dimension_numbers = #tpu.dot_dimension_numbers<[1], [0], [0], [1], [0, 0, 1, 1], [], []>} : vector<16x64xf32>, vector<64x32xf32>, vector<16x32xf32> -> vector<16x32xf32>
    %150 = arith.addf %123, %149 : vector<16x32xf32>
    %151 = vector.broadcast %14 : vector<1x32xf32> to vector<16x32xf32>
    %152 = arith.addf %150, %151 : vector<16x32xf32>
    %c136 = arith.constant 136 : index
    %c0_45 = arith.constant 0 : index
    %153 = vector.load %arg1[%c136, %c0_45] : memref<274x128xf32, #tpu.memory_space<vmem>>, vector<32x96xf32>
    %c136_46 = arith.constant 136 : index
    %c96_47 = arith.constant 96 : index
    %154 = vector.load %arg1[%c136_46, %c96_47] : memref<274x128xf32, #tpu.memory_space<vmem>>, vector<32x32xf32>
    %c168 = arith.constant 168 : index
    %c0_48 = arith.constant 0 : index
    %155 = vector.load %arg1[%c168, %c0_48] : memref<274x128xf32, #tpu.memory_space<vmem>>, vector<32x64xf32>
    %c200 = arith.constant 200 : index
    %c0_49 = arith.constant 0 : index
    %156 = vector.load %arg1[%c200, %c0_49] : memref<274x128xf32, #tpu.memory_space<vmem>>, vector<64x32xf32>
    %c264 = arith.constant 264 : index
    %c0_50 = arith.constant 0 : index
    %157 = vector.load %arg1[%c264, %c0_50] : memref<274x128xf32, #tpu.memory_space<vmem>>, vector<1x96xf32>
    %c265 = arith.constant 265 : index
    %c0_51 = arith.constant 0 : index
    %158 = vector.load %arg1[%c265, %c0_51] : memref<274x128xf32, #tpu.memory_space<vmem>>, vector<1x64xf32>
    %c266 = arith.constant 266 : index
    %c0_52 = arith.constant 0 : index
    %159 = vector.load %arg1[%c266, %c0_52] : memref<274x128xf32, #tpu.memory_space<vmem>>, vector<1x32xf32>
    %c267 = arith.constant 267 : index
    %c0_53 = arith.constant 0 : index
    %160 = vector.load %arg1[%c267, %c0_53] : memref<274x128xf32, #tpu.memory_space<vmem>>, vector<1x32xf32>
    %c268 = arith.constant 268 : index
    %c0_54 = arith.constant 0 : index
    %161 = vector.load %arg1[%c268, %c0_54] : memref<274x128xf32, #tpu.memory_space<vmem>>, vector<1x32xf32>
    %c269 = arith.constant 269 : index
    %c0_55 = arith.constant 0 : index
    %162 = vector.load %arg1[%c269, %c0_55] : memref<274x128xf32, #tpu.memory_space<vmem>>, vector<1x32xf32>
    %c270 = arith.constant 270 : index
    %c0_56 = arith.constant 0 : index
    %163 = vector.load %arg1[%c270, %c0_56] : memref<274x128xf32, #tpu.memory_space<vmem>>, vector<1x32xf32>
    %c271 = arith.constant 271 : index
    %c0_57 = arith.constant 0 : index
    %164 = vector.load %arg1[%c271, %c0_57] : memref<274x128xf32, #tpu.memory_space<vmem>>, vector<1x32xf32>
    %cst_58 = arith.constant dense<0.000000e+00> : vector<16xf32>
    %165 = vector.multi_reduction <add>, %152, %cst_58 [1] : vector<16x32xf32> to vector<16xf32>
    %166 = vector.shape_cast %165 : vector<16xf32> to vector<16x1xf32>
    %cst_59 = arith.constant 3.200000e+01 : f32
    %167 = vector.broadcast %cst_59 : f32 to vector<16x1xf32>
    %168 = arith.divf %166, %167 : vector<16x1xf32>
    %169 = vector.broadcast %168 : vector<16x1xf32> to vector<16x32xf32>
    %170 = arith.subf %152, %169 : vector<16x32xf32>
    %171 = arith.mulf %170, %170 : vector<16x32xf32>
    %cst_60 = arith.constant dense<0.000000e+00> : vector<16xf32>
    %172 = vector.multi_reduction <add>, %171, %cst_60 [1] : vector<16x32xf32> to vector<16xf32>
    %173 = vector.shape_cast %172 : vector<16xf32> to vector<16x1xf32>
    %cst_61 = arith.constant 0.0322580636 : f32
    %174 = vector.broadcast %cst_61 : f32 to vector<16x1xf32>
    %175 = arith.mulf %173, %174 : vector<16x1xf32>
    %176 = math.sqrt %175 : vector<16x1xf32>
    %177 = vector.broadcast %159 : vector<1x32xf32> to vector<16x32xf32>
    %178 = arith.mulf %177, %170 : vector<16x32xf32>
    %cst_62 = arith.constant 9.99999997E-7 : f32
    %179 = vector.broadcast %cst_62 : f32 to vector<16x1xf32>
    %180 = arith.addf %176, %179 : vector<16x1xf32>
    %181 = vector.broadcast %180 : vector<16x1xf32> to vector<16x32xf32>
    %182 = arith.divf %178, %181 : vector<16x32xf32>
    %183 = vector.broadcast %160 : vector<1x32xf32> to vector<16x32xf32>
    %184 = arith.addf %182, %183 : vector<16x32xf32>
    %cst_63 = arith.constant dense<0.000000e+00> : vector<16x96xf32>
    %185 = tpu.matmul %184, %153, %cst_63 {dimension_numbers = #tpu.dot_dimension_numbers<[1], [0], [0], [1], [0, 0, 1, 1], [], []>} : vector<16x32xf32>, vector<32x96xf32>, vector<16x96xf32> -> vector<16x96xf32>
    %186 = vector.broadcast %157 : vector<1x96xf32> to vector<16x96xf32>
    %187 = arith.addf %185, %186 : vector<16x96xf32>
    %188 = vector.extract_strided_slice %187 {offsets = [0, 0], sizes = [16, 8], strides = [1, 1]} : vector<16x96xf32> to vector<16x8xf32>
    %189 = vector.shape_cast %188 : vector<16x8xf32> to vector<2x8x8xf32>
    %190 = vector.extract_strided_slice %187 {offsets = [0, 32], sizes = [16, 8], strides = [1, 1]} : vector<16x96xf32> to vector<16x8xf32>
    %191 = vector.shape_cast %190 : vector<16x8xf32> to vector<2x8x8xf32>
    %192 = vector.extract_strided_slice %187 {offsets = [0, 64], sizes = [16, 8], strides = [1, 1]} : vector<16x96xf32> to vector<16x8xf32>
    %193 = vector.shape_cast %192 : vector<16x8xf32> to vector<2x8x8xf32>
    "tpu.trace_start"() <{level = 10 : i32, message = "bqd,bkd->bqk"}> : () -> ()
    %cst_64 = arith.constant dense<0.000000e+00> : vector<2x8x8xf32>
    %194 = tpu.matmul %189, %191, %cst_64 {dimension_numbers = #tpu.dot_dimension_numbers<[2], [2], [1], [1], [0, 0, 0, 1, 1, 1], [0], [0]>} : vector<2x8x8xf32>, vector<2x8x8xf32>, vector<2x8x8xf32> -> vector<2x8x8xf32>
    "tpu.trace_stop"() : () -> ()
    %195 = vector.broadcast %2 : vector<2x1x8xf32> to vector<2x8x8xf32>
    %196 = arith.addf %194, %195 : vector<2x8x8xf32>
    %cst_65 = arith.constant dense<0xFF800000> : vector<2x8xf32>
    %197 = vector.multi_reduction <maximumf>, %196, %cst_65 [2] : vector<2x8x8xf32> to vector<2x8xf32>
    %198 = vector.shape_cast %197 : vector<2x8xf32> to vector<2x8x1xf32>
    %199 = vector.broadcast %198 : vector<2x8x1xf32> to vector<2x8x8xf32>
    %200 = arith.subf %196, %199 : vector<2x8x8xf32>
    %201 = math.exp %200 : vector<2x8x8xf32>
    %cst_66 = arith.constant dense<0.000000e+00> : vector<2x8xf32>
    %202 = vector.multi_reduction <add>, %201, %cst_66 [2] : vector<2x8x8xf32> to vector<2x8xf32>
    %203 = vector.shape_cast %202 : vector<2x8xf32> to vector<2x8x1xf32>
    %204 = tpu.reciprocal %203 {approx = true} : vector<2x8x1xf32> -> vector<2x8x1xf32>
    %205 = vector.broadcast %204 : vector<2x8x1xf32> to vector<2x8x8xf32>
    %206 = arith.mulf %201, %205 : vector<2x8x8xf32>
    "tpu.trace_start"() <{level = 10 : i32, message = "bqk,bkd->bqd"}> : () -> ()
    %cst_67 = arith.constant dense<0.000000e+00> : vector<2x8x8xf32>
    %207 = tpu.matmul %206, %193, %cst_67 {dimension_numbers = #tpu.dot_dimension_numbers<[2], [1], [1], [2], [0, 0, 0, 1, 1, 2], [0], [0]>} : vector<2x8x8xf32>, vector<2x8x8xf32>, vector<2x8x8xf32> -> vector<2x8x8xf32>
    "tpu.trace_stop"() : () -> ()
    %208 = vector.extract_strided_slice %187 {offsets = [0, 8], sizes = [16, 8], strides = [1, 1]} : vector<16x96xf32> to vector<16x8xf32>
    %209 = vector.shape_cast %208 : vector<16x8xf32> to vector<2x8x8xf32>
    %210 = vector.extract_strided_slice %187 {offsets = [0, 40], sizes = [16, 8], strides = [1, 1]} : vector<16x96xf32> to vector<16x8xf32>
    %211 = vector.shape_cast %210 : vector<16x8xf32> to vector<2x8x8xf32>
    %212 = vector.extract_strided_slice %187 {offsets = [0, 72], sizes = [16, 8], strides = [1, 1]} : vector<16x96xf32> to vector<16x8xf32>
    %213 = vector.shape_cast %212 : vector<16x8xf32> to vector<2x8x8xf32>
    "tpu.trace_start"() <{level = 10 : i32, message = "bqd,bkd->bqk"}> : () -> ()
    %cst_68 = arith.constant dense<0.000000e+00> : vector<2x8x8xf32>
    %214 = tpu.matmul %209, %211, %cst_68 {dimension_numbers = #tpu.dot_dimension_numbers<[2], [2], [1], [1], [0, 0, 0, 1, 1, 1], [0], [0]>} : vector<2x8x8xf32>, vector<2x8x8xf32>, vector<2x8x8xf32> -> vector<2x8x8xf32>
    "tpu.trace_stop"() : () -> ()
    %215 = vector.broadcast %2 : vector<2x1x8xf32> to vector<2x8x8xf32>
    %216 = arith.addf %214, %215 : vector<2x8x8xf32>
    %cst_69 = arith.constant dense<0xFF800000> : vector<2x8xf32>
    %217 = vector.multi_reduction <maximumf>, %216, %cst_69 [2] : vector<2x8x8xf32> to vector<2x8xf32>
    %218 = vector.shape_cast %217 : vector<2x8xf32> to vector<2x8x1xf32>
    %219 = vector.broadcast %218 : vector<2x8x1xf32> to vector<2x8x8xf32>
    %220 = arith.subf %216, %219 : vector<2x8x8xf32>
    %221 = math.exp %220 : vector<2x8x8xf32>
    %cst_70 = arith.constant dense<0.000000e+00> : vector<2x8xf32>
    %222 = vector.multi_reduction <add>, %221, %cst_70 [2] : vector<2x8x8xf32> to vector<2x8xf32>
    %223 = vector.shape_cast %222 : vector<2x8xf32> to vector<2x8x1xf32>
    %224 = tpu.reciprocal %223 {approx = true} : vector<2x8x1xf32> -> vector<2x8x1xf32>
    %225 = vector.broadcast %224 : vector<2x8x1xf32> to vector<2x8x8xf32>
    %226 = arith.mulf %221, %225 : vector<2x8x8xf32>
    "tpu.trace_start"() <{level = 10 : i32, message = "bqk,bkd->bqd"}> : () -> ()
    %cst_71 = arith.constant dense<0.000000e+00> : vector<2x8x8xf32>
    %227 = tpu.matmul %226, %213, %cst_71 {dimension_numbers = #tpu.dot_dimension_numbers<[2], [1], [1], [2], [0, 0, 0, 1, 1, 2], [0], [0]>} : vector<2x8x8xf32>, vector<2x8x8xf32>, vector<2x8x8xf32> -> vector<2x8x8xf32>
    "tpu.trace_stop"() : () -> ()
    %228 = vector.extract_strided_slice %187 {offsets = [0, 16], sizes = [16, 8], strides = [1, 1]} : vector<16x96xf32> to vector<16x8xf32>
    %229 = vector.shape_cast %228 : vector<16x8xf32> to vector<2x8x8xf32>
    %230 = vector.extract_strided_slice %187 {offsets = [0, 48], sizes = [16, 8], strides = [1, 1]} : vector<16x96xf32> to vector<16x8xf32>
    %231 = vector.shape_cast %230 : vector<16x8xf32> to vector<2x8x8xf32>
    %232 = vector.extract_strided_slice %187 {offsets = [0, 80], sizes = [16, 8], strides = [1, 1]} : vector<16x96xf32> to vector<16x8xf32>
    %233 = vector.shape_cast %232 : vector<16x8xf32> to vector<2x8x8xf32>
    "tpu.trace_start"() <{level = 10 : i32, message = "bqd,bkd->bqk"}> : () -> ()
    %cst_72 = arith.constant dense<0.000000e+00> : vector<2x8x8xf32>
    %234 = tpu.matmul %229, %231, %cst_72 {dimension_numbers = #tpu.dot_dimension_numbers<[2], [2], [1], [1], [0, 0, 0, 1, 1, 1], [0], [0]>} : vector<2x8x8xf32>, vector<2x8x8xf32>, vector<2x8x8xf32> -> vector<2x8x8xf32>
    "tpu.trace_stop"() : () -> ()
    %235 = vector.broadcast %2 : vector<2x1x8xf32> to vector<2x8x8xf32>
    %236 = arith.addf %234, %235 : vector<2x8x8xf32>
    %cst_73 = arith.constant dense<0xFF800000> : vector<2x8xf32>
    %237 = vector.multi_reduction <maximumf>, %236, %cst_73 [2] : vector<2x8x8xf32> to vector<2x8xf32>
    %238 = vector.shape_cast %237 : vector<2x8xf32> to vector<2x8x1xf32>
    %239 = vector.broadcast %238 : vector<2x8x1xf32> to vector<2x8x8xf32>
    %240 = arith.subf %236, %239 : vector<2x8x8xf32>
    %241 = math.exp %240 : vector<2x8x8xf32>
    %cst_74 = arith.constant dense<0.000000e+00> : vector<2x8xf32>
    %242 = vector.multi_reduction <add>, %241, %cst_74 [2] : vector<2x8x8xf32> to vector<2x8xf32>
    %243 = vector.shape_cast %242 : vector<2x8xf32> to vector<2x8x1xf32>
    %244 = tpu.reciprocal %243 {approx = true} : vector<2x8x1xf32> -> vector<2x8x1xf32>
    %245 = vector.broadcast %244 : vector<2x8x1xf32> to vector<2x8x8xf32>
    %246 = arith.mulf %241, %245 : vector<2x8x8xf32>
    "tpu.trace_start"() <{level = 10 : i32, message = "bqk,bkd->bqd"}> : () -> ()
    %cst_75 = arith.constant dense<0.000000e+00> : vector<2x8x8xf32>
    %247 = tpu.matmul %246, %233, %cst_75 {dimension_numbers = #tpu.dot_dimension_numbers<[2], [1], [1], [2], [0, 0, 0, 1, 1, 2], [0], [0]>} : vector<2x8x8xf32>, vector<2x8x8xf32>, vector<2x8x8xf32> -> vector<2x8x8xf32>
    "tpu.trace_stop"() : () -> ()
    %248 = vector.extract_strided_slice %187 {offsets = [0, 24], sizes = [16, 8], strides = [1, 1]} : vector<16x96xf32> to vector<16x8xf32>
    %249 = vector.shape_cast %248 : vector<16x8xf32> to vector<2x8x8xf32>
    %250 = vector.extract_strided_slice %187 {offsets = [0, 56], sizes = [16, 8], strides = [1, 1]} : vector<16x96xf32> to vector<16x8xf32>
    %251 = vector.shape_cast %250 : vector<16x8xf32> to vector<2x8x8xf32>
    %252 = vector.extract_strided_slice %187 {offsets = [0, 88], sizes = [16, 8], strides = [1, 1]} : vector<16x96xf32> to vector<16x8xf32>
    %253 = vector.shape_cast %252 : vector<16x8xf32> to vector<2x8x8xf32>
    "tpu.trace_start"() <{level = 10 : i32, message = "bqd,bkd->bqk"}> : () -> ()
    %cst_76 = arith.constant dense<0.000000e+00> : vector<2x8x8xf32>
    %254 = tpu.matmul %249, %251, %cst_76 {dimension_numbers = #tpu.dot_dimension_numbers<[2], [2], [1], [1], [0, 0, 0, 1, 1, 1], [0], [0]>} : vector<2x8x8xf32>, vector<2x8x8xf32>, vector<2x8x8xf32> -> vector<2x8x8xf32>
    "tpu.trace_stop"() : () -> ()
    %255 = vector.broadcast %2 : vector<2x1x8xf32> to vector<2x8x8xf32>
    %256 = arith.addf %254, %255 : vector<2x8x8xf32>
    %cst_77 = arith.constant dense<0xFF800000> : vector<2x8xf32>
    %257 = vector.multi_reduction <maximumf>, %256, %cst_77 [2] : vector<2x8x8xf32> to vector<2x8xf32>
    %258 = vector.shape_cast %257 : vector<2x8xf32> to vector<2x8x1xf32>
    %259 = vector.broadcast %258 : vector<2x8x1xf32> to vector<2x8x8xf32>
    %260 = arith.subf %256, %259 : vector<2x8x8xf32>
    %261 = math.exp %260 : vector<2x8x8xf32>
    %cst_78 = arith.constant dense<0.000000e+00> : vector<2x8xf32>
    %262 = vector.multi_reduction <add>, %261, %cst_78 [2] : vector<2x8x8xf32> to vector<2x8xf32>
    %263 = vector.shape_cast %262 : vector<2x8xf32> to vector<2x8x1xf32>
    %264 = tpu.reciprocal %263 {approx = true} : vector<2x8x1xf32> -> vector<2x8x1xf32>
    %265 = vector.broadcast %264 : vector<2x8x1xf32> to vector<2x8x8xf32>
    %266 = arith.mulf %261, %265 : vector<2x8x8xf32>
    "tpu.trace_start"() <{level = 10 : i32, message = "bqk,bkd->bqd"}> : () -> ()
    %cst_79 = arith.constant dense<0.000000e+00> : vector<2x8x8xf32>
    %267 = tpu.matmul %266, %253, %cst_79 {dimension_numbers = #tpu.dot_dimension_numbers<[2], [1], [1], [2], [0, 0, 0, 1, 1, 2], [0], [0]>} : vector<2x8x8xf32>, vector<2x8x8xf32>, vector<2x8x8xf32> -> vector<2x8x8xf32>
    "tpu.trace_stop"() : () -> ()
    %268 = tpu.concatenate %207, %227, %247, %267 in 2 : vector<2x8x8xf32>, vector<2x8x8xf32>, vector<2x8x8xf32>, vector<2x8x8xf32> -> vector<2x8x32xf32>
    %269 = vector.shape_cast %268 : vector<2x8x32xf32> to vector<16x32xf32>
    %cst_80 = arith.constant dense<0.000000e+00> : vector<16x32xf32>
    %270 = tpu.matmul %269, %154, %cst_80 {dimension_numbers = #tpu.dot_dimension_numbers<[1], [0], [0], [1], [0, 0, 1, 1], [], []>} : vector<16x32xf32>, vector<32x32xf32>, vector<16x32xf32> -> vector<16x32xf32>
    %271 = arith.addf %152, %270 : vector<16x32xf32>
    %272 = vector.broadcast %163 : vector<1x32xf32> to vector<16x32xf32>
    %273 = arith.addf %271, %272 : vector<16x32xf32>
    %cst_81 = arith.constant dense<0.000000e+00> : vector<16xf32>
    %274 = vector.multi_reduction <add>, %273, %cst_81 [1] : vector<16x32xf32> to vector<16xf32>
    %275 = vector.shape_cast %274 : vector<16xf32> to vector<16x1xf32>
    %cst_82 = arith.constant 3.200000e+01 : f32
    %276 = vector.broadcast %cst_82 : f32 to vector<16x1xf32>
    %277 = arith.divf %275, %276 : vector<16x1xf32>
    %278 = vector.broadcast %277 : vector<16x1xf32> to vector<16x32xf32>
    %279 = arith.subf %273, %278 : vector<16x32xf32>
    %280 = arith.mulf %279, %279 : vector<16x32xf32>
    %cst_83 = arith.constant dense<0.000000e+00> : vector<16xf32>
    %281 = vector.multi_reduction <add>, %280, %cst_83 [1] : vector<16x32xf32> to vector<16xf32>
    %282 = vector.shape_cast %281 : vector<16xf32> to vector<16x1xf32>
    %cst_84 = arith.constant 0.0322580636 : f32
    %283 = vector.broadcast %cst_84 : f32 to vector<16x1xf32>
    %284 = arith.mulf %282, %283 : vector<16x1xf32>
    %285 = math.sqrt %284 : vector<16x1xf32>
    %286 = vector.broadcast %161 : vector<1x32xf32> to vector<16x32xf32>
    %287 = arith.mulf %286, %279 : vector<16x32xf32>
    %cst_85 = arith.constant 9.99999997E-7 : f32
    %288 = vector.broadcast %cst_85 : f32 to vector<16x1xf32>
    %289 = arith.addf %285, %288 : vector<16x1xf32>
    %290 = vector.broadcast %289 : vector<16x1xf32> to vector<16x32xf32>
    %291 = arith.divf %287, %290 : vector<16x32xf32>
    %292 = vector.broadcast %162 : vector<1x32xf32> to vector<16x32xf32>
    %293 = arith.addf %291, %292 : vector<16x32xf32>
    %cst_86 = arith.constant dense<0.000000e+00> : vector<16x64xf32>
    %294 = tpu.matmul %293, %155, %cst_86 {dimension_numbers = #tpu.dot_dimension_numbers<[1], [0], [0], [1], [0, 0, 1, 1], [], []>} : vector<16x32xf32>, vector<32x64xf32>, vector<16x64xf32> -> vector<16x64xf32>
    %295 = vector.broadcast %158 : vector<1x64xf32> to vector<16x64xf32>
    %296 = arith.addf %294, %295 : vector<16x64xf32>
    %cst_87 = arith.constant 0.000000e+00 : f32
    %297 = vector.broadcast %cst_87 : f32 to vector<16x64xf32>
    %298 = arith.maximumf %296, %297 : vector<16x64xf32>
    %cst_88 = arith.constant dense<0.000000e+00> : vector<16x32xf32>
    %299 = tpu.matmul %298, %156, %cst_88 {dimension_numbers = #tpu.dot_dimension_numbers<[1], [0], [0], [1], [0, 0, 1, 1], [], []>} : vector<16x64xf32>, vector<64x32xf32>, vector<16x32xf32> -> vector<16x32xf32>
    %300 = arith.addf %273, %299 : vector<16x32xf32>
    %301 = vector.broadcast %164 : vector<1x32xf32> to vector<16x32xf32>
    %302 = arith.addf %300, %301 : vector<16x32xf32>
    %c272 = arith.constant 272 : index
    %c0_89 = arith.constant 0 : index
    %303 = vector.load %arg1[%c272, %c0_89] : memref<274x128xf32, #tpu.memory_space<vmem>>, vector<1x32xf32>
    %c273 = arith.constant 273 : index
    %c0_90 = arith.constant 0 : index
    %304 = vector.load %arg1[%c273, %c0_90] : memref<274x128xf32, #tpu.memory_space<vmem>>, vector<1x32xf32>
    %cst_91 = arith.constant dense<0.000000e+00> : vector<16xf32>
    %305 = vector.multi_reduction <add>, %302, %cst_91 [1] : vector<16x32xf32> to vector<16xf32>
    %306 = vector.shape_cast %305 : vector<16xf32> to vector<16x1xf32>
    %cst_92 = arith.constant 3.200000e+01 : f32
    %307 = vector.broadcast %cst_92 : f32 to vector<16x1xf32>
    %308 = arith.divf %306, %307 : vector<16x1xf32>
    %309 = vector.broadcast %308 : vector<16x1xf32> to vector<16x32xf32>
    %310 = arith.subf %302, %309 : vector<16x32xf32>
    %311 = arith.mulf %310, %310 : vector<16x32xf32>
    %cst_93 = arith.constant dense<0.000000e+00> : vector<16xf32>
    %312 = vector.multi_reduction <add>, %311, %cst_93 [1] : vector<16x32xf32> to vector<16xf32>
    %313 = vector.shape_cast %312 : vector<16xf32> to vector<16x1xf32>
    %cst_94 = arith.constant 0.0322580636 : f32
    %314 = vector.broadcast %cst_94 : f32 to vector<16x1xf32>
    %315 = arith.mulf %313, %314 : vector<16x1xf32>
    %316 = math.sqrt %315 : vector<16x1xf32>
    %317 = vector.broadcast %303 : vector<1x32xf32> to vector<16x32xf32>
    %318 = arith.mulf %317, %310 : vector<16x32xf32>
    %cst_95 = arith.constant 9.99999997E-7 : f32
    %319 = vector.broadcast %cst_95 : f32 to vector<16x1xf32>
    %320 = arith.addf %316, %319 : vector<16x1xf32>
    %321 = vector.broadcast %320 : vector<16x1xf32> to vector<16x32xf32>
    %322 = arith.divf %318, %321 : vector<16x32xf32>
    %323 = vector.broadcast %304 : vector<1x32xf32> to vector<16x32xf32>
    %324 = arith.addf %322, %323 : vector<16x32xf32>
    %c0_96 = arith.constant 0 : index
    %c0_97 = arith.constant 0 : index
    %325 = vector.load %arg2[%c0_96, %c0_97] : memref<16x32xf32, #tpu.memory_space<vmem>>, vector<16x32xf32>
    tpu.vector_store %arg2[%c0_96, %c0_97], %324 {strides = array<i32>} : memref<16x32xf32, #tpu.memory_space<vmem>>, vector<16x32xf32>,
    return
  }
}

</mosaic_0001>

<bundles_post_ra>
// kernel: encoder_forward.1
= control target key start
LH: loop header
LB: loop body
LE: loop exit
PB: predicated region body
PF: predicated region fallthrough
CT: control target
= control target key end

     0   :  { %7 = vsyncpa [#allocation3], 0  ;;  %s5104_s0 = inlined_call_operand.vmem [shape: f32[18,32], index: 0, kind: input, shape index: {}]   ;;  %s5105_s1 = inlined_call_operand.hbm [shape: f32[274,128], index: 1, kind: input, shape index: {}]   ;;  %s5106_s2 = inlined_call_operand.hbm [shape: f32[16,32], index: 2, kind: output, shape index: {}]  }
   0x1   :  { %8 = vsyncpa [#allocation4], 0  ;;  %s4565_s9 = smov [#allocation2]   ;;  %s4517_s13 = scalar_lea.hbm %s5105_s1, 4480 }
   0x2   :  { %s16_s10 = sshll.u32 %s4565_s9, 4  ;;  %p4518_p0 = scmp.ne.s32.totalorder %s5105_s1, %s4517_s13  ;;  %s17_s10 = int_to_ptr.vmem [resolvable:$true] %s16_s10 }
   0x3   :  { %p4521_p1 = scmp.lt.u32.totalorder %s4517_s13, %s5105_s1 }
   0x5   :  { %p4523_p2 = pnand %p4521_p1, %p4518_p0 }
   0x7   :  { %4526 = shalt.err (!%p4523_p2)
}
   0x8   :  { %s4527_s18 = scalar_lea.vmem %s17_s10, 4480  ;;  %p4532_p4 = scmp.lt.s32.totalorder %s17_s10, %s17_s10 }
   0x9   :  { %p4528_p3 = scmp.ne.s32.totalorder %s17_s10, %s4527_s18  ;;  %p4533_p5 = scmp.lt.s32.totalorder %s4527_s18, %s4527_s18 }
   0xb   :  { %p4534_p6 = por %p4533_p5, %p4532_p4 }
   0xd   :  { %p4535_p7 = pnand %p4534_p6, %p4528_p3 }
   0xf   :  { %4538 = shalt.err (!%p4535_p7)
}
  0x10   :  { %s4566_s19 = smov 128   ;;  %s4567_s20 = smov 8  }
  0x11   :  { %22 = dma.hbm_to_vmem [thread:$0]  %s5105_s1, 4480, %s17_s10, [#allocation3], %s4566_s19, %s4566_s19, %s4567_s20  }
  0x12   :  { %4561 = dma.done.wait [#allocation3], 4480  }
  0x13   :  { %4562 = vsyncadd [#allocation3], 4294962816  ;;  %vm76_vm0 = vcmask 261120   ;;  %v4619_v0 = vld [vmem:[%s5104_s0] sm:$0xff]  ;;  %v4624_v1 = vld [vmem:[%s5104_s0 + $0x8] sm:$0xff]  ;;  %v4568_v47 = vmov 0.0   ;;  %v41_v57 = vlaneseq }
  0x14   :  { %v77_v2 = vsel %vm76_vm0, %v4619_v0, 0.0  ;;  %v80_v3 = vsel %vm76_vm0, %v4624_v1, 0.0  ;;  %v4634_v14 = vld [vmem:[#allocation2] sm:$0xff]  ;;  %v4636_v15 = vld [vmem:[#allocation2 + $0x8] sm:$0xff]  ;;  %v4638_v16 = vld [vmem:[#allocation2 + $0x10] sm:$0xff]  ;;  %4049 = vmatprep.subr.mxu0 %v4568_v47  ;;  %vm4569_vm5 = vmmov 0  }
  0x15   :  { %78 = vadd.xlane.f32.xlu0 %v77_v2  ;;  %v4393_v17 = vpack.i.bf16 %v4636_v15, %v4634_v14  ;;  %v4292_v18 = vpack.c.bf16 %v4636_v15, %v4634_v14  ;;  %v4644_v19 = vld [vmem:[#allocation2 + $0x18] sm:$0xff]  ;;  %v3826_v37 = vld [vmem:[#allocation2 + $0x82] ss:$0 sm:$0xff]  ;;  %v3827_v40 = vld [vmem:[#allocation2 + $0x83] ss:$0 sm:$0xff]  ;;  %4051 = vmatprep.mubr.msk.f32.mxu0 %vm4569_vm5, %v4568_v47  ;;  %s4570_s1 = smov 96  }
  0x16   :  { %v4296_v20 = vpack.c.bf16 %v4644_v19, %v4638_v16  ;;  %v3828_v48 = vld [vmem:[#allocation2 + $0x80] ss:$0 sm:$0xff]  ;;  %vm228_vm6 = vcmask 64512   ;;  %v4571_v55 = vmov 1966171168   ;;  %v42_v59 = vshrl.u32 %v41_v57, 7 }
  0x17   :  { %4293 = vmatprep.subr.bf16.mxu1 %v4292_v18  ;;  %v39_v56 = vunpack.c.l.s4 %v4571_v55  ;;  %v3825_v61 = vld.sshfl [vmem:[%s5104_s0 + $0x10] sm:$0x11 pattern:$0x75316420]  ;;  %s4572_s0 = smov 64   ;;  %s4573_s29 = smov 88  }
  0x18   :  { %4295 = vmatpush3.bf16.msra.mxu1 %v4292_v18  ;;  %v217_v63 = vsub.s32 0, %v42_v59  ;;  %v37_v2 = vcombine.high %v3825_v61, %v3825_v61  ;;  %s4574_s30 = smov 120   ;;  %s4575_s3 = smov 56   ;;  %vm1573_vm7 = vcmask 195584   ;;  %vm1570_vm8 = vcmask 130048  }
  0x19   :  { %81 = vadd.xlane.f32.xlu0 %v80_v3  ;;  %4297 = vmatprep.subr.bf16.mxu1 %v4296_v20  ;;  %v40_v58 = vunpack.c.0.s8 %v39_v56  ;;  %s4576_s4 = smov 80   ;;  %s4577_s5 = smov 112   ;;  %vm1820_vm13 = vcmask 523264  }
  0x1a   :  { %s4578_s6 = smov 48   ;;  %s4579_s7 = smov 72  }
  0x1b   :  { %v43_v60 = vsub.s32 %v40_v58, %v42_v59  ;;  %s4580_s8 = smov 104   ;;  %s4581_s9 = smov 40  }
  0x1c   :  { %4299 = vmatpush3.bf16.msra.mxu1 %v4296_v20  ;;  %s4582_s10 = smov 32   ;;  %s4583_s11 = smov 16  }
  0x1d   :  { %4039 = vmatprep.subr.mxu1 %v4568_v47  ;;  %v44_v62 = vrot.slane %v3825_v61, %v43_v60  ;;  %s4584_s12 = smov 24   ;;  %s4585_s13 = smov [#allocation5]  }
  0x1e   :  { %s3813_s14 = sshll.u32 %s4585_s13, 4  ;;  %s3814_s14 = int_to_ptr.vmem [resolvable:$true] %s3813_s14 }
  0x1f   :  { %v4679_v3 = vrot.slane %v44_v62, %v217_v63  ;;  %s4539_s15 = scalar_lea.vmem %s3814_s14, 256  ;;  %p4544_p9 = scmp.lt.s32.totalorder %s3814_s14, %s3814_s14 }
  0x20   :  { %p4540_p8 = scmp.ne.s32.totalorder %s3814_s14, %s4539_s15  ;;  %p4545_p10 = scmp.lt.s32.totalorder %s4539_s15, %s4539_s15 }
  0x22   :  { %p4546_p11 = por %p4545_p10, %p4544_p9 }
  0x24   :  { %p4547_p12 = pnand %p4546_p11, %p4540_p8 }
  0xa2   :  { %v79_v4 = vpop.xlane.xlu0 %78 }
  0xa3   :  { %v84_v5 = vmul.f32 0.03125, %v79_v4  ;;  %v51_v4 = vrot.slane %v37_v2, %v43_v60 }
  0xa5   :  { %v86_v6 = vsub.f32 %v4619_v0, %v84_v5 }
  0xa6   :  { %v82_v7 = vpop.xlane.xlu0 %81 }
  0xa7   :  { %v85_v8 = vmul.f32 0.03125, %v82_v7  ;;  %v88_v9 = vmul.f32 %v86_v6, %v86_v6  ;;  %v116_v38 = vmul.f32 %v3826_v37, %v86_v6 }
  0xa9   :  { %v87_v10 = vsub.f32 %v4624_v1, %v85_v8  ;;  %v90_v11 = vsel %vm76_vm0, %v88_v9, 0.0  ;;  %v4682_v8 = vrot.slane %v51_v4, %v217_v63 }
  0xaa   :  { %91 = vadd.xlane.f32.xlu1 %v90_v11 }
  0xab   :  { %v89_v12 = vmul.f32 %v87_v10, %v87_v10  ;;  %v117_v42 = vmul.f32 %v3826_v37, %v87_v10 }
  0xad   :  { %v93_v13 = vsel %vm76_vm0, %v89_v12, 0.0 }
  0xae   :  { %94 = vadd.xlane.f32.xlu1 %v93_v13 }
 0x137   :  { %v92_v21 = vpop.xlane.xlu1 %91 }
 0x138   :  { %v96_v22 = vmul.f32 0.032258064, %v92_v21 }
 0x13a   :  { %4413 = vrsqrt.f32 %v96_v22  ;;  %vm100_vm1 = vcmp.eq.f32.partialorder %v96_v22, inf  ;;  %v103_v27 = vand.u32 2147483648, %v96_v22  ;;  %vm102_vm2 = vcmp.eq.f32.partialorder %v96_v22, 0.0 }
 0x13b   :  { %v95_v23 = vpop.xlane.xlu1 %94 }
 0x13c   :  { %v97_v24 = vmul.f32 0.032258064, %v95_v23 }
 0x13e   :  { %4415 = vrsqrt.f32 %v97_v24  ;;  %vm107_vm3 = vcmp.eq.f32.partialorder %v97_v24, inf  ;;  %v110_v33 = vand.u32 2147483648, %v97_v24  ;;  %vm109_vm4 = vcmp.eq.f32.partialorder %v97_v24, 0.0 }
 0x144   :  { %v4414_v25 = vpop.eup %4413 }
 0x145   :  { %v99_v26 = vmul.f32 %v4414_v25, %v96_v22 }
 0x147   :  { %v101_v28 = vsel %vm100_vm1, %v96_v22, %v99_v26 }
 0x148   :  { %v4416_v29 = vpop.eup %4415  ;;  %v104_v30 = vsel %vm102_vm2, %v103_v27, %v101_v28 }
 0x149   :  { %v106_v31 = vmul.f32 %v4416_v29, %v97_v24  ;;  %v118_v32 = vadd.f32 1e-06, %v104_v30 }
 0x14b   :  { %v108_v34 = vsel %vm107_vm3, %v97_v24, %v106_v31  ;;  %4417 = vrcp.f32 %v118_v32 }
 0x14c   :  { %v111_v35 = vsel %vm109_vm4, %v110_v33, %v108_v34 }
 0x14d   :  { %v119_v36 = vadd.f32 1e-06, %v111_v35 }
 0x14f   :  { %4419 = vrcp.f32 %v119_v36 }
 0x155   :  { %v4418_v39 = vpop.eup %4417 }
 0x156   :  { %v121_v41 = vmul.f32 %v4418_v39, %v116_v38 }
 0x158   :  { %v128_v43 = vadd.f32 %v3827_v40, %v121_v41 }
 0x159   :  { %v4420_v44 = vpop.eup %4419 }
 0x15a   :  { %v123_v45 = vmul.f32 %v4420_v44, %v117_v42  ;;  %4036 = vmatprep.mubr.msk.f32.mxu1 %vm76_vm0, %v128_v43 }
 0x15c   :  { %v129_v46 = vadd.f32 %v3827_v40, %v123_v45 }
 0x15e   :  { %4037 = vmatmul.mubr.msk.f32.vlgmr.msra.gmra.mrb[0].mxu1 %vm76_vm0, %v129_v46 }
 0x15f   :  { %4041 = vmatprep.mubr.msk.f32.mxu1 %vm4569_vm5, %v4568_v47 }
 0x231   :  { %v4038_v49 = vpop.f32.mrb[0].mxu1 }
 0x232   :  { %v4656_v50 = vadd.f32 %v4038_v49, %v3828_v48  ;;  %v206_v51 = vpop.f32.mrb[1].mxu1 }
 0x233   :  { %v4658_v52 = vadd.f32 %v3828_v48, %v206_v51 }
 0x234   :  { %304 = vrot.lane.b32.xlu1 %v4656_v50, %s4570_s1 }
 0x235   :  { %226 = vrot.lane.b32.xlu0 %v4658_v52, %s4570_s1 }
 0x2a6   :  { %v305_v54 = vpop.permute.xlu1 %304 }
 0x2a7   :  { %v227_v53 = vpop.permute.xlu0 %226 }
 0x2a8   :  { %4040 = vmatpush3.xpose.msk.msra.mxu1 %vm228_vm6, %v227_v53 }
 0x2a9   :  { %4044 = vmatprep.subr.mxu1 %v4568_v47 }
 0x2ab   :  { %4042 = vmatmul.mubr.msk.f32.vlgmr.msra.gmra.mrb[2].mxu1 %vm228_vm6, %v4658_v52 }
 0x2ac   :  { %4045 = vmatpush3.xpose.msk.msra.mxu1 %vm228_vm6, %v305_v54  ;;  %4046 = vmatprep.mubr.msk.f32.mxu1 %vm4569_vm5, %v4568_v47 }
 0x2ad   :  { %4054 = vmatprep.subr.mxu1 %v4568_v47 }
 0x2af   :  { %4047 = vmatmul.mubr.msk.f32.vlgmr.msra.gmra.mrb[4].mxu1 %vm228_vm6, %v4656_v50 }
 0x2b0   :  { %4056 = vmatprep.mubr.msk.f32.mxu1 %vm4569_vm5, %v4568_v47 }
 0x37e   :  { %v299_v5 = vpop.f32.mrb[2].mxu1 }
 0x37f   :  { %v300_v6 = vadd.f32 %v299_v5, %v4679_v3  ;;  %v4043_v7 = vpop.f32.mrb[3].mxu1 }
 0x381   :  { %v380_v9 = vsel %vm228_vm6, %v300_v6, -inf }
 0x382   :  { %381 = vmax.xlane.f32.xlu1 %v380_v9  ;;  %v376_v10 = vpop.f32.mrb[4].mxu1 }
 0x383   :  { %v377_v11 = vadd.f32 %v376_v10, %v4682_v8  ;;  %v4048_v12 = vpop.f32.mrb[5].mxu1 }
 0x385   :  { %v383_v13 = vsel %vm228_vm6, %v377_v11, -inf }
 0x386   :  { %384 = vmax.xlane.f32.xlu0 %v383_v13 }
 0x393   :  { %478 = vrot.lane.b32.xlu1 %v4656_v50, %s4572_s0 }
 0x397   :  { %556 = vrot.lane.b32.xlu1 %v4658_v52, %s4573_s29 }
 0x39b   :  { %634 = vrot.lane.b32.xlu1 %v4656_v50, %s4573_s29 }
 0x39c   :  { %402 = vrot.lane.b32.xlu0 %v4658_v52, %s4572_s0 }
 0x40f   :  { %v382_v18 = vpop.xlane.xlu1 %381 }
 0x410   :  { %v386_v20 = vsub.f32 %v300_v6, %v382_v18 }
 0x412   :  { %v388_v21 = vmul.f32 1.442695, %v386_v20 }
 0x413   :  { %v479_v22 = vpop.permute.xlu1 %478  ;;  %v385_v23 = vpop.xlane.xlu0 %384 }
 0x414   :  { %4421 = vpow2.f32 %v388_v21  ;;  %v387_v24 = vsub.f32 %v377_v11, %v385_v23  ;;  %4055 = vmatpush3.msra.mxu1 %v479_v22 }
 0x415   :  { %4064 = vmatprep.subr.mxu1 %v4568_v47 }
 0x416   :  { %v390_v25 = vmul.f32 1.442695, %v387_v24 }
 0x417   :  { %v403_v26 = vpop.permute.xlu0 %402  ;;  %v557_v31 = vpop.permute.xlu1 %556 }
 0x418   :  { %4423 = vpow2.f32 %v390_v25  ;;  %4050 = vmatpush3.msra.mxu0 %v403_v26 }
 0x419   :  { %4059 = vmatprep.subr.mxu0 %v4568_v47 }
 0x41b   :  { %v635_v32 = vpop.permute.xlu1 %634 }
 0x41e   :  { %v4422_v27 = vpop.eup %4421 }
 0x41f   :  { %v392_v28 = vsel %vm228_vm6, %v4422_v27, 0.0 }
 0x420   :  { %393 = vadd.xlane.f32.xlu0 %v392_v28 }
 0x422   :  { %v4424_v29 = vpop.eup %4423 }
 0x423   :  { %v395_v30 = vsel %vm228_vm6, %v4424_v29, 0.0 }
 0x424   :  { %396 = vadd.xlane.f32.xlu1 %v395_v30 }
 0x435   :  { %632 = vrot.lane.b32.xlu1 %v4656_v50, %s4574_s30 }
 0x436   :  { %554 = vrot.lane.b32.xlu0 %v4658_v52, %s4574_s30 }
 0x4ad   :  { %v394_v33 = vpop.xlane.xlu0 %393 }
 0x4ae   :  { %4425 = vrcp.f32 %v394_v33 }
 0x4b1   :  { %v397_v34 = vpop.xlane.xlu1 %396  ;;  %v555_v39 = vpop.permute.xlu0 %554 }
 0x4b2   :  { %4427 = vrcp.f32 %v397_v34 }
 0x4b5   :  { %v633_v40 = vpop.permute.xlu1 %632 }
 0x4b8   :  { %v4426_v35 = vpop.eup %4425 }
 0x4b9   :  { %v400_v36 = vmul.f32 %v4426_v35, %v4422_v27 }
 0x4bb   :  { %4052 = vmatmul.mubr.msk.f32.vlgmr.msra.gmra.mrb[0].mxu0 %vm228_vm6, %v400_v36 }
 0x4bc   :  { %v4428_v37 = vpop.eup %4427  ;;  %4060 = vmatpush3.xpose.msk.msra.mxu0 %vm228_vm6, %v557_v31  ;;  %4061 = vmatprep.mubr.msk.f32.mxu0 %vm4569_vm5, %v4568_v47 }
 0x4bd   :  { %v401_v38 = vmul.f32 %v4428_v37, %v4424_v29  ;;  %4069 = vmatprep.subr.mxu0 %v4568_v47 }
 0x4bf   :  { %4057 = vmatmul.mubr.msk.f32.vlgmr.msra.gmra.mrb[6].mxu1 %vm228_vm6, %v401_v38  ;;  %4062 = vmatmul.mubr.msk.f32.vlgmr.msra.gmra.mrb[2].mxu0 %vm228_vm6, %v555_v39 }
 0x4c0   :  { %4065 = vmatpush3.xpose.msk.msra.mxu1 %vm228_vm6, %v635_v32  ;;  %4066 = vmatprep.mubr.msk.f32.mxu1 %vm4569_vm5, %v4568_v47 }
 0x4c1   :  { %4074 = vmatprep.subr.mxu1 %v4568_v47  ;;  %4071 = vmatprep.mubr.msk.f32.mxu0 %vm4569_vm5, %v4568_v47 }
 0x4c3   :  { %4067 = vmatmul.mubr.msk.f32.vlgmr.msra.gmra.mrb[8].mxu1 %vm228_vm6, %v633_v40 }
 0x4c4   :  { %4076 = vmatprep.mubr.msk.f32.mxu1 %vm4569_vm5, %v4568_v47 }
 0x58e   :  { %v4719_v41 = vpop.f32.mrb[0].mxu0 }
 0x58f   :  { %v4053_v42 = vpop.f32.mrb[1].mxu0 }
 0x592   :  { %v4721_v43 = vpop.f32.mrb[6].mxu1  ;;  %v628_v44 = vpop.f32.mrb[2].mxu0 }
 0x593   :  { %v629_v45 = vadd.f32 %v628_v44, %v4679_v3  ;;  %v4058_v46 = vpop.f32.mrb[7].mxu1  ;;  %v4063_v48 = vpop.f32.mrb[3].mxu0 }
 0x595   :  { %v710_v49 = vsel %vm228_vm6, %v629_v45, -inf }
 0x596   :  { %711 = vmax.xlane.f32.xlu0 %v710_v49  ;;  %v706_v51 = vpop.f32.mrb[8].mxu1 }
 0x597   :  { %v707_v53 = vadd.f32 %v706_v51, %v4682_v8  ;;  %v4068_v54 = vpop.f32.mrb[9].mxu1 }
 0x599   :  { %v713_v55 = vsel %vm228_vm6, %v707_v53, -inf }
 0x59a   :  { %714 = vmax.xlane.f32.xlu1 %v713_v55 }
 0x5ab   :  { %808 = vrot.lane.b32.xlu1 %v4656_v50, %s4575_s3 }
 0x5ac   :  { %732 = vrot.lane.b32.xlu0 %v4658_v52, %s4575_s3 }
 0x5af   :  { %886 = vrot.lane.b32.xlu1 %v4658_v52, %s4576_s4 }
 0x5b3   :  { %964 = vrot.lane.b32.xlu1 %v4656_v50, %s4576_s4 }
 0x5b7   :  { %962 = vrot.lane.b32.xlu1 %v4656_v50, %s4577_s5 }
 0x623   :  { %v712_v56 = vpop.xlane.xlu0 %711 }
 0x624   :  { %v716_v57 = vsub.f32 %v629_v45, %v712_v56 }
 0x626   :  { %v718_v58 = vmul.f32 1.442695, %v716_v57 }
 0x627   :  { %v733_v59 = vpop.permute.xlu0 %732  ;;  %v715_v60 = vpop.xlane.xlu1 %714 }
 0x628   :  { %4429 = vpow2.f32 %v718_v58  ;;  %v717_v61 = vsub.f32 %v707_v53, %v715_v60  ;;  %4070 = vmatpush3.msra.mxu0 %v733_v59 }
 0x629   :  { %4079 = vmatprep.subr.mxu0 %v4568_v47 }
 0x62a   :  { %v720_v62 = vmul.f32 1.442695, %v717_v61 }
 0x62b   :  { %v809_v63 = vpop.permute.xlu1 %808 }
 0x62c   :  { %4431 = vpow2.f32 %v720_v62  ;;  %4075 = vmatpush3.msra.mxu1 %v809_v63 }
 0x62d   :  { %4084 = vmatprep.subr.mxu1 %v4568_v47 }
 0x62f   :  { %v887_v10 = vpop.permute.xlu1 %886 }
 0x632   :  { %v4430_v2 = vpop.eup %4429 }
 0x633   :  { %v722_v4 = vsel %vm228_vm6, %v4430_v2, 0.0  ;;  %v965_v18 = vpop.permute.xlu1 %964 }
 0x634   :  { %723 = vadd.xlane.f32.xlu0 %v722_v4 }
 0x636   :  { %v4432_v5 = vpop.eup %4431 }
 0x637   :  { %v725_v6 = vsel %vm228_vm6, %v4432_v5, 0.0  ;;  %v963_v22 = vpop.permute.xlu1 %962 }
 0x638   :  { %726 = vadd.xlane.f32.xlu0 %v725_v6 }
 0x64e   :  { %884 = vrot.lane.b32.xlu0 %v4658_v52, %s4577_s5 }
 0x6c1   :  { %v724_v7 = vpop.xlane.xlu0 %723 }
 0x6c2   :  { %4433 = vrcp.f32 %v724_v7 }
 0x6c5   :  { %v727_v9 = vpop.xlane.xlu0 %726 }
 0x6c6   :  { %4435 = vrcp.f32 %v727_v9 }
 0x6c9   :  { %v885_v21 = vpop.permute.xlu0 %884 }
 0x6cc   :  { %v4434_v11 = vpop.eup %4433 }
 0x6cd   :  { %v730_v12 = vmul.f32 %v4434_v11, %v4430_v2 }
 0x6cf   :  { %4072 = vmatmul.mubr.msk.f32.vlgmr.msra.gmra.mrb[4].mxu0 %vm228_vm6, %v730_v12 }
 0x6d0   :  { %v4436_v13 = vpop.eup %4435  ;;  %4080 = vmatpush3.xpose.msk.msra.mxu0 %vm228_vm6, %v887_v10  ;;  %4081 = vmatprep.mubr.msk.f32.mxu0 %vm4569_vm5, %v4568_v47 }
 0x6d1   :  { %v731_v20 = vmul.f32 %v4436_v13, %v4432_v5  ;;  %4089 = vmatprep.subr.mxu0 %v4568_v47 }
 0x6d3   :  { %4077 = vmatmul.mubr.msk.f32.vlgmr.msra.gmra.mrb[10].mxu1 %vm228_vm6, %v731_v20  ;;  %4082 = vmatmul.mubr.msk.f32.vlgmr.msra.gmra.mrb[6].mxu0 %vm228_vm6, %v885_v21 }
 0x6d4   :  { %4085 = vmatpush3.xpose.msk.msra.mxu1 %vm228_vm6, %v965_v18  ;;  %4086 = vmatprep.mubr.msk.f32.mxu1 %vm4569_vm5, %v4568_v47  ;;  %v4398_v18 = vpack.i.bf16 %v4644_v19, %v4638_v16 }
 0x6d5   :  { %4094 = vmatprep.subr.mxu1 %v4568_v47  ;;  %4091 = vmatprep.mubr.msk.f32.mxu0 %vm4569_vm5, %v4568_v47 }
 0x6d7   :  { %4087 = vmatmul.mubr.msk.f32.vlgmr.msra.gmra.mrb[12].mxu1 %vm228_vm6, %v963_v22 }
 0x6d8   :  { %4096 = vmatprep.mubr.msk.f32.mxu1 %vm4569_vm5, %v4568_v47 }
 0x7a2   :  { %v4759_v23 = vpop.f32.mrb[4].mxu0 }
 0x7a3   :  { %v4073_v24 = vpop.f32.mrb[5].mxu0 }
 0x7a6   :  { %v4761_v25 = vpop.f32.mrb[10].mxu1  ;;  %v958_v26 = vpop.f32.mrb[6].mxu0 }
 0x7a7   :  { %v959_v27 = vadd.f32 %v958_v26, %v4679_v3  ;;  %v4078_v28 = vpop.f32.mrb[11].mxu1  ;;  %v4083_v29 = vpop.f32.mrb[7].mxu0 }
 0x7a9   :  { %v1040_v30 = vsel %vm228_vm6, %v959_v27, -inf }
 0x7aa   :  { %1041 = vmax.xlane.f32.xlu0 %v1040_v30  ;;  %v1036_v31 = vpop.f32.mrb[12].mxu1 }
 0x7ab   :  { %v1037_v32 = vadd.f32 %v1036_v31, %v4682_v8  ;;  %v4088_v33 = vpop.f32.mrb[13].mxu1 }
 0x7ad   :  { %v1043_v34 = vsel %vm228_vm6, %v1037_v32, -inf }
 0x7ae   :  { %1044 = vmax.xlane.f32.xlu1 %v1043_v34 }
 0x7bf   :  { %1138 = vrot.lane.b32.xlu1 %v4656_v50, %s4578_s6 }
 0x7c0   :  { %1062 = vrot.lane.b32.xlu0 %v4658_v52, %s4578_s6 }
 0x7c3   :  { %1216 = vrot.lane.b32.xlu1 %v4658_v52, %s4579_s7 }
 0x7c7   :  { %1294 = vrot.lane.b32.xlu1 %v4656_v50, %s4579_s7 }
 0x7cb   :  { %1292 = vrot.lane.b32.xlu1 %v4656_v50, %s4580_s8 }
 0x837   :  { %v1042_v35 = vpop.xlane.xlu0 %1041 }
 0x838   :  { %v1046_v36 = vsub.f32 %v959_v27, %v1042_v35 }
 0x83a   :  { %v1048_v37 = vmul.f32 1.442695, %v1046_v36 }
 0x83b   :  { %v1063_v38 = vpop.permute.xlu0 %1062  ;;  %v1045_v39 = vpop.xlane.xlu1 %1044 }
 0x83c   :  { %4437 = vpow2.f32 %v1048_v37  ;;  %v1047_v40 = vsub.f32 %v1037_v32, %v1045_v39  ;;  %4090 = vmatpush3.msra.mxu0 %v1063_v38 }
 0x83d   :  { %4099 = vmatprep.subr.mxu0 %v4568_v47 }
 0x83e   :  { %v1050_v42 = vmul.f32 1.442695, %v1047_v40 }
 0x83f   :  { %v1139_v44 = vpop.permute.xlu1 %1138 }
 0x840   :  { %4439 = vpow2.f32 %v1050_v42  ;;  %4095 = vmatpush3.msra.mxu1 %v1139_v44 }
 0x841   :  { %4104 = vmatprep.subr.mxu1 %v4568_v47 }
 0x843   :  { %v1217_v54 = vpop.permute.xlu1 %1216 }
 0x846   :  { %v4438_v45 = vpop.eup %4437 }
 0x847   :  { %v1052_v46 = vsel %vm228_vm6, %v4438_v45, 0.0  ;;  %v1295_v58 = vpop.permute.xlu1 %1294 }
 0x848   :  { %1053 = vadd.xlane.f32.xlu0 %v1052_v46 }
 0x84a   :  { %v4440_v48 = vpop.eup %4439 }
 0x84b   :  { %v1055_v49 = vsel %vm228_vm6, %v4440_v48, 0.0  ;;  %v1293_v61 = vpop.permute.xlu1 %1292 }
 0x84c   :  { %1056 = vadd.xlane.f32.xlu0 %v1055_v49 }
 0x862   :  { %1214 = vrot.lane.b32.xlu0 %v4658_v52, %s4580_s8 }
 0x8d5   :  { %v1054_v51 = vpop.xlane.xlu0 %1053 }
 0x8d6   :  { %4441 = vrcp.f32 %v1054_v51 }
 0x8d9   :  { %v1057_v53 = vpop.xlane.xlu0 %1056 }
 0x8da   :  { %4443 = vrcp.f32 %v1057_v53 }
 0x8dd   :  { %v1215_v60 = vpop.permute.xlu0 %1214 }
 0x8e0   :  { %v4442_v55 = vpop.eup %4441 }
 0x8e1   :  { %v1060_v56 = vmul.f32 %v4442_v55, %v4438_v45 }
 0x8e3   :  { %4092 = vmatmul.mubr.msk.f32.vlgmr.msra.gmra.mrb[8].mxu0 %vm228_vm6, %v1060_v56 }
 0x8e4   :  { %v4444_v57 = vpop.eup %4443  ;;  %4100 = vmatpush3.xpose.msk.msra.mxu0 %vm228_vm6, %v1217_v54  ;;  %4101 = vmatprep.mubr.msk.f32.mxu0 %vm4569_vm5, %v4568_v47 }
 0x8e5   :  { %v1061_v59 = vmul.f32 %v4444_v57, %v4440_v48  ;;  %4109 = vmatprep.subr.mxu0 %v4568_v47 }
 0x8e7   :  { %4097 = vmatmul.mubr.msk.f32.vlgmr.msra.gmra.mrb[14].mxu1 %vm228_vm6, %v1061_v59  ;;  %4102 = vmatmul.mubr.msk.f32.vlgmr.msra.gmra.mrb[10].mxu0 %vm228_vm6, %v1215_v60  ;;  %v3857_v60 = vld [vmem:[#allocation2 + $0x86] ss:$0 sm:$0xff] }
 0x8e8   :  { %4105 = vmatpush3.xpose.msk.msra.mxu1 %vm228_vm6, %v1295_v58  ;;  %4106 = vmatprep.mubr.msk.f32.mxu1 %vm4569_vm5, %v4568_v47 }
 0x8e9   :  { %4114 = vmatprep.subr.mxu1 %v4568_v47  ;;  %4111 = vmatprep.mubr.msk.f32.mxu0 %vm4569_vm5, %v4568_v47 }
 0x8eb   :  { %4107 = vmatmul.mubr.msk.f32.vlgmr.msra.gmra.mrb[16].mxu1 %vm228_vm6, %v1293_v61 }
 0x8ec   :  { %4116 = vmatprep.mubr.msk.f32.mxu1 %vm4569_vm5, %v4568_v47 }
 0x9b6   :  { %v1134_v62 = vpop.f32.mrb[8].mxu0 }
 0x9b7   :  { %v4093_v63 = vpop.f32.mrb[9].mxu0 }
 0x9ba   :  { %v1210_v2 = vpop.f32.mrb[14].mxu1  ;;  %v1288_v4 = vpop.f32.mrb[10].mxu0 }
 0x9bb   :  { %v1289_v5 = vadd.f32 %v1288_v4, %v4679_v3  ;;  %v4098_v6 = vpop.f32.mrb[15].mxu1  ;;  %v4103_v7 = vpop.f32.mrb[11].mxu0 }
 0x9bd   :  { %v1370_v9 = vsel %vm228_vm6, %v1289_v5, -inf }
 0x9be   :  { %1371 = vmax.xlane.f32.xlu0 %v1370_v9  ;;  %v1366_v10 = vpop.f32.mrb[16].mxu1 }
 0x9bf   :  { %v1367_v11 = vadd.f32 %v1366_v10, %v4682_v8  ;;  %v4108_v12 = vpop.f32.mrb[17].mxu1 }
 0x9c1   :  { %v1373_v13 = vsel %vm228_vm6, %v1367_v11, -inf }
 0x9c2   :  { %1374 = vmax.xlane.f32.xlu1 %v1373_v13 }
 0x9d3   :  { %1468 = vrot.lane.b32.xlu1 %v4656_v50, %s4581_s9 }
 0x9d7   :  { %4394 = vrot.lane.b32.xlu1 %v4393_v17, %s4582_s10 }
 0x9db   :  { %4399 = vrot.lane.b32.xlu1 %v4398_v18, %s4582_s10 }
 0x9df   :  { %1548 = vrot.lane.b32.xlu1 %v4761_v25, %s4567_s20 }
 0x9e3   :  { %1556 = vrot.lane.b32.xlu1 %v1210_v2, %s4583_s11 }
 0xa4b   :  { %v1372_v20 = vpop.xlane.xlu0 %1371 }
 0xa4c   :  { %v1376_v21 = vsub.f32 %v1289_v5, %v1372_v20  ;;  %v56_v20 = vld [vmem:[#allocation2 + $0x20] sm:$0xff] }
 0xa4e   :  { %v1378_v50 = vmul.f32 1.442695, %v1376_v21  ;;  %v57_v21 = vld [vmem:[#allocation2 + $0x28] sm:$0xff] }
 0xa4f   :  { %v1375_v22 = vpop.xlane.xlu1 %1374 }
 0xa50   :  { %4445 = vpow2.f32 %v1378_v50  ;;  %v1377_v24 = vsub.f32 %v1367_v11, %v1375_v22  ;;  %v58_v50 = vld [vmem:[#allocation2 + $0x30] sm:$0xff]  ;;  %v4308_v22 = vpack.c.bf16 %v57_v21, %v56_v20 }
 0xa52   :  { %v1380_v26 = vmul.f32 1.442695, %v1377_v24  ;;  %v59_v24 = vld [vmem:[#allocation2 + $0x38] sm:$0xff] }
 0xa53   :  { %v1469_v14 = vpop.permute.xlu1 %1468 }
 0xa54   :  { %4447 = vpow2.f32 %v1380_v26  ;;  %4115 = vmatpush3.msra.mxu1 %v1469_v14  ;;  %v4312_v26 = vpack.c.bf16 %v59_v24, %v58_v50  ;;  %v60_v14 = vld [vmem:[#allocation2 + $0x40] sm:$0xff] }
 0xa55   :  { %4309 = vmatprep.subr.bf16.mxu1 %v4308_v22 }
 0xa57   :  { %v4395_v27 = vpop.permute.xlu1 %4394 }
 0xa58   :  { %v4397_v28 = vunpack.i.h.bf16 %v4395_v27  ;;  %v4396_v29 = vunpack.i.l.bf16 %v4395_v27  ;;  %v64_v27 = vld [vmem:[#allocation2 + $0x60] sm:$0xff] }
 0xa5a   :  { %v4446_v15 = vpop.eup %4445  ;;  %v4300_v31 = vpack.c.bf16 %v4397_v28, %v4396_v29  ;;  %v65_v28 = vld [vmem:[#allocation2 + $0x68] sm:$0xff] }
 0xa5b   :  { %v1382_v16 = vsel %vm228_vm6, %v4446_v15, 0.0  ;;  %v4400_v32 = vpop.permute.xlu1 %4399  ;;  %v4324_v29 = vpack.c.bf16 %v65_v28, %v64_v27  ;;  %v4879_v28 = vld [vmem:[#allocation2 + $0xa0] sm:$0xff] }
 0xa5c   :  { %1383 = vadd.xlane.f32.xlu0 %v1382_v16  ;;  %v4402_v33 = vunpack.i.h.bf16 %v4400_v32  ;;  %v4401_v34 = vunpack.i.l.bf16 %v4400_v32  ;;  %v62_v16 = vld [vmem:[#allocation2 + $0x50] sm:$0xff] }
 0xa5e   :  { %v4448_v17 = vpop.eup %4447  ;;  %v4304_v36 = vpack.c.bf16 %v4402_v33, %v4401_v34 }
 0xa5f   :  { %v1385_v19 = vsel %vm228_vm6, %v4448_v17, 0.0  ;;  %v1549_v46 = vpop.permute.xlu1 %1548 }
 0xa60   :  { %1386 = vadd.xlane.f32.xlu0 %v1385_v19  ;;  %v1569_v56 = vsel %vm228_vm6, %v4721_v43, %v1549_v46  ;;  %v63_v19 = vld [vmem:[#allocation2 + $0x58] sm:$0xff]  ;;  %v3858_v46 = vld [vmem:[#allocation2 + $0x84] ss:$0 sm:$0xff] }
 0xa63   :  { %v1557_v51 = vpop.permute.xlu1 %1556 }
 0xa64   :  { %v1572_v57 = vsel %vm1570_vm8, %v1569_v56, %v1557_v51  ;;  %v3859_v51 = vld [vmem:[#allocation2 + $0x85] ss:$0 sm:$0xff] }
 0xa76   :  { %1392 = vrot.lane.b32.xlu0 %v4658_v52, %s4581_s9 }
 0xa7a   :  { %1546 = vrot.lane.b32.xlu0 %v4759_v23, %s4567_s20 }
 0xa7e   :  { %1554 = vrot.lane.b32.xlu0 %v1134_v62, %s4583_s11 }
 0xae9   :  { %v1384_v25 = vpop.xlane.xlu0 %1383 }
 0xaea   :  { %4449 = vrcp.f32 %v1384_v25  ;;  %v4320_v25 = vpack.c.bf16 %v63_v19, %v62_v16  ;;  %v4873_v19 = vld [vmem:[#allocation2 + $0x90] sm:$0xff] }
 0xaed   :  { %v1387_v30 = vpop.xlane.xlu0 %1386 }
 0xaee   :  { %4451 = vrcp.f32 %v1387_v30 }
 0xaf1   :  { %v1393_v35 = vpop.permute.xlu0 %1392 }
 0xaf2   :  { %4110 = vmatpush3.msra.mxu0 %v1393_v35 }
 0xaf3   :  { %4301 = vmatprep.subr.bf16.mxu0 %v4300_v31 }
 0xaf4   :  { %v4450_v52 = vpop.eup %4449 }
 0xaf5   :  { %v1390_v37 = vmul.f32 %v4450_v52, %v4446_v15  ;;  %v1547_v45 = vpop.permute.xlu0 %1546  ;;  %v61_v15 = vld [vmem:[#allocation2 + $0x48] sm:$0xff] }
 0xaf6   :  { %v1568_v49 = vsel %vm228_vm6, %v4719_v41, %v1547_v45 }
 0xaf7   :  { %4112 = vmatmul.mubr.msk.f32.vlgmr.msra.gmra.mrb[12].mxu0 %vm228_vm6, %v1390_v37 }
 0xaf8   :  { %v4452_v23 = vpop.eup %4451  ;;  %4303 = vmatpush3.bf16.msra.mxu0 %v4300_v31 }
 0xaf9   :  { %v1391_v38 = vmul.f32 %v4452_v23, %v4448_v17  ;;  %4305 = vmatprep.subr.bf16.mxu0 %v4304_v36  ;;  %v1555_v48 = vpop.permute.xlu0 %1554  ;;  %v4316_v17 = vpack.c.bf16 %v61_v15, %v60_v14 }
 0xafa   :  { %v1571_v53 = vsel %vm1570_vm8, %v1568_v49, %v1555_v48 }
 0xafb   :  { %4117 = vmatmul.mubr.msk.f32.vlgmr.msra.gmra.mrb[18].mxu1 %vm228_vm6, %v1391_v38 }
 0xafc   :  { %4307 = vmatpush3.bf16.msra.mxu0 %v4304_v36  ;;  %4311 = vmatpush3.bf16.msra.mxu1 %v4308_v22 }
 0xafd   :  { %4313 = vmatprep.subr.bf16.mxu1 %v4312_v26  ;;  %4317 = vmatprep.subr.bf16.mxu0 %v4316_v17 }
 0xb00   :  { %4315 = vmatpush3.bf16.msra.mxu1 %v4312_v26 }
 0xbca   :  { %v1464_v39 = vpop.f32.mrb[12].mxu0 }
 0xbcb   :  { %1562 = vrot.lane.b32.xlu0 %v1464_v39, %s4584_s12  ;;  %v4113_v40 = vpop.f32.mrb[13].mxu0 }
 0xbce   :  { %v1540_v42 = vpop.f32.mrb[18].mxu1 }
 0xbcf   :  { %1564 = vrot.lane.b32.xlu1 %v1540_v42, %s4584_s12  ;;  %v4118_v44 = vpop.f32.mrb[19].mxu1 }
 0xc3d   :  { %v1563_v54 = vpop.permute.xlu0 %1562 }
 0xc3e   :  { %v1574_v55 = vsel %vm1573_vm7, %v1571_v53, %v1563_v54 }
 0xc3f   :  { %4127 = vmatprep.mubr.msk.f32.mxu0 %vm76_vm0, %v1574_v55 }
 0xc41   :  { %v1565_v58 = vpop.permute.xlu1 %1564 }
 0xc42   :  { %v1575_v59 = vsel %vm1573_vm7, %v1572_v57, %v1565_v58 }
 0xc43   :  { %4128 = vmatmul.mubr.msk.f32.vlgmr.msra.gmra.mrb[14].mxu0 %vm76_vm0, %v1575_v59  ;;  %v66_v59 = vld [vmem:[#allocation2 + $0x70] sm:$0xff] }
 0xc44   :  { %4319 = vmatpush3.bf16.msra.mxu0 %v4316_v17  ;;  %v4871_v17 = vld [vmem:[#allocation2 + $0x88] sm:$0xff] }
 0xc45   :  { %4321 = vmatprep.subr.bf16.mxu0 %v4320_v25  ;;  %v4332_v27 = vpack.c.bf16 %v4873_v19, %v4871_v17 }
 0xc47   :  { %4333 = vmatprep.subr.bf16.mxu1 %v4332_v27 }
 0xc48   :  { %4323 = vmatpush3.bf16.msra.mxu0 %v4320_v25  ;;  %v4875_v25 = vld [vmem:[#allocation2 + $0x98] sm:$0xff] }
 0xc49   :  { %4325 = vmatprep.subr.bf16.mxu0 %v4324_v29 }
 0xc4c   :  { %4327 = vmatpush3.bf16.msra.mxu0 %v4324_v29  ;;  %v4408_v29 = vpack.i.bf16 %v4879_v28, %v4875_v25 }
 0xd16   :  { %v4129_v41 = vpop.f32.mrb[14].mxu0 }
 0xd17   :  { %v1674_v61 = vadd.f32 %v4129_v41, %v4624_v1  ;;  %v1664_v62 = vpop.f32.mrb[15].mxu0 }
 0xd18   :  { %v1673_v63 = vadd.f32 %v1664_v62, %v4619_v0 }
 0xd19   :  { %v4838_v2 = vadd.f32 %v3857_v60, %v1674_v61  ;;  %v3860_v61 = vld [vmem:[#allocation2 + $0x81] ss:$0 sm:$0xff] }
 0xd1a   :  { %v4840_v4 = vadd.f32 %v3857_v60, %v1673_v63  ;;  %v67_v60 = vld [vmem:[#allocation2 + $0x78] sm:$0xff] }
 0xd1b   :  { %v1684_v43 = vsel %vm76_vm0, %v4838_v2, 0.0  ;;  %v4328_v41 = vpack.c.bf16 %v67_v60, %v66_v59  ;;  %v3868_v60 = vld [vmem:[#allocation2 + $0x108] ss:$0 sm:$0xff] }
 0xd1c   :  { %1685 = vadd.xlane.f32.xlu1 %v1684_v43  ;;  %v1681_v5 = vsel %vm76_vm0, %v4840_v4, 0.0 }
 0xd1d   :  { %1682 = vadd.xlane.f32.xlu0 %v1681_v5  ;;  %4329 = vmatprep.subr.bf16.mxu0 %v4328_v41 }
 0xd1e   :  { %4331 = vmatpush3.bf16.msra.mxu0 %v4328_v41 }
 0xd1f   :  { %4181 = vmatprep.subr.mxu0 %v4568_v47 }
 0xda9   :  { %v1686_v6 = vpop.xlane.xlu1 %1685 }
 0xdaa   :  { %v1688_v7 = vmul.f32 0.03125, %v1686_v6  ;;  %v1683_v9 = vpop.xlane.xlu0 %1682 }
 0xdab   :  { %v1687_v10 = vmul.f32 0.03125, %v1683_v9  ;;  %v3865_v9 = vld [vmem:[#allocation2 + $0x87] ss:$0 sm:$0xff] }
 0xdac   :  { %v1690_v1 = vsub.f32 %v4838_v2, %v1688_v7 }
 0xdad   :  { %v1689_v0 = vsub.f32 %v4840_v4, %v1687_v10 }
 0xdae   :  { %v1692_v13 = vmul.f32 %v1690_v1, %v1690_v1  ;;  %v1720_v54 = vmul.f32 %v3858_v46, %v1690_v1 }
 0xdaf   :  { %v1691_v11 = vmul.f32 %v1689_v0, %v1689_v0  ;;  %v1719_v48 = vmul.f32 %v3858_v46, %v1689_v0 }
 0xdb0   :  { %v1696_v18 = vsel %vm76_vm0, %v1692_v13, 0.0 }
 0xdb1   :  { %v1693_v12 = vsel %vm76_vm0, %v1691_v11, 0.0 }
 0xdb2   :  { %1694 = vadd.xlane.f32.xlu0 %v1693_v12 }
 0xdb6   :  { %1697 = vadd.xlane.f32.xlu0 %v1696_v18 }
 0xe3f   :  { %v1695_v30 = vpop.xlane.xlu0 %1694 }
 0xe40   :  { %v1699_v31 = vmul.f32 0.032258064, %v1695_v30  ;;  %v4336_v30 = vpack.c.bf16 %v4879_v28, %v4875_v25 }
 0xe42   :  { %4453 = vrsqrt.f32 %v1699_v31  ;;  %vm1703_vm9 = vcmp.eq.f32.partialorder %v1699_v31, inf  ;;  %v1706_v52 = vand.u32 2147483648, %v1699_v31  ;;  %vm1705_vm10 = vcmp.eq.f32.partialorder %v1699_v31, 0.0 }
 0xe43   :  { %v1698_v32 = vpop.xlane.xlu0 %1697 }
 0xe44   :  { %v1700_v33 = vmul.f32 0.032258064, %v1698_v32 }
 0xe46   :  { %4455 = vrsqrt.f32 %v1700_v33  ;;  %vm1710_vm11 = vcmp.eq.f32.partialorder %v1700_v33, inf  ;;  %v1713_v40 = vand.u32 2147483648, %v1700_v33  ;;  %vm1712_vm12 = vcmp.eq.f32.partialorder %v1700_v33, 0.0 }
 0xe4c   :  { %v4454_v34 = vpop.eup %4453 }
 0xe4d   :  { %v1702_v35 = vmul.f32 %v4454_v34, %v1699_v31 }
 0xe4f   :  { %v1704_v36 = vsel %vm1703_vm9, %v1699_v31, %v1702_v35 }
 0xe50   :  { %v4456_v37 = vpop.eup %4455  ;;  %v1707_v23 = vsel %vm1705_vm10, %v1706_v52, %v1704_v36 }
 0xe51   :  { %v1709_v38 = vmul.f32 %v4456_v37, %v1700_v33  ;;  %v1721_v39 = vadd.f32 1e-06, %v1707_v23 }
 0xe53   :  { %v1711_v42 = vsel %vm1710_vm11, %v1700_v33, %v1709_v38  ;;  %4457 = vrcp.f32 %v1721_v39 }
 0xe54   :  { %v1714_v44 = vsel %vm1712_vm12, %v1713_v40, %v1711_v42 }
 0xe55   :  { %v1722_v45 = vadd.f32 1e-06, %v1714_v44 }
 0xe57   :  { %4459 = vrcp.f32 %v1722_v45 }
 0xe5d   :  { %v4458_v49 = vpop.eup %4457 }
 0xe5e   :  { %v1724_v53 = vmul.f32 %v4458_v49, %v1719_v48  ;;  %v3866_v48 = vld [vmem:[#allocation2 + $0x10a] ss:$0 sm:$0xff] }
 0xe60   :  { %v1731_v55 = vadd.f32 %v3859_v51, %v1724_v53 }
 0xe61   :  { %v4460_v56 = vpop.eup %4459 }
 0xe62   :  { %v1726_v57 = vmul.f32 %v4460_v56, %v1720_v54  ;;  %4138 = vmatprep.mubr.msk.f32.mxu1 %vm76_vm0, %v1731_v55  ;;  %v3867_v55 = vld [vmem:[#allocation2 + $0x10b] ss:$0 sm:$0xff] }
 0xe64   :  { %v1732_v58 = vadd.f32 %v3859_v51, %v1726_v57 }
 0xe66   :  { %4139 = vmatmul.mubr.msk.f32.vlgmr.msra.gmra.mrb[20].mxu1 %vm76_vm0, %v1732_v58 }
 0xe67   :  { %4335 = vmatpush3.bf16.msra.mxu1 %v4332_v27 }
 0xe68   :  { %4337 = vmatprep.subr.bf16.mxu1 %v4336_v30 }
 0xe6b   :  { %4339 = vmatpush3.bf16.msra.mxu1 %v4336_v30 }
 0xe6c   :  { %4171 = vmatprep.subr.mxu1 %v4568_v47 }
 0xf39   :  { %v4140_v62 = vpop.f32.mrb[20].mxu1 }
 0xf3a   :  { %v1815_v63 = vadd.f32 %v4140_v62, %v3860_v61  ;;  %v1809_v43 = vpop.f32.mrb[21].mxu1 }
 0xf3b   :  { %v1810_v5 = vadd.f32 %v3860_v61, %v1809_v43 }
 0xf3c   :  { %v1819_v7 = vmax.f32 %v1815_v63, 0.0 }
 0xf3d   :  { %v1818_v6 = vmax.f32 %v1810_v5, 0.0 }
 0xf3f   :  { %4157 = vmatprep.mubr.msk.f32.mxu0 %vm1820_vm13, %v1818_v6 }
 0xf40   :  { %4158 = vmatmul.mubr.msk.f32.vlgmr.msra.gmra.mrb[16].mxu0 %vm1820_vm13, %v1819_v7 }
 0xf41   :  { %4183 = vmatprep.mubr.msk.f32.mxu0 %vm4569_vm5, %v4568_v47 }
0x1013   :  { %v4159_v10 = vpop.f32.mrb[16].mxu0 }
0x1014   :  { %v1903_v1 = vadd.f32 %v4159_v10, %v4838_v2  ;;  %v1893_v0 = vpop.f32.mrb[17].mxu0 }
0x1015   :  { %v1902_v11 = vadd.f32 %v1893_v0, %v4840_v4 }
0x1016   :  { %v4859_v12 = vadd.f32 %v3865_v9, %v1903_v1 }
0x1017   :  { %v4861_v13 = vadd.f32 %v3865_v9, %v1902_v11 }
0x1018   :  { %v1937_v18 = vsel %vm76_vm0, %v4859_v12, 0.0 }
0x1019   :  { %1938 = vadd.xlane.f32.xlu1 %v1937_v18  ;;  %v1934_v20 = vsel %vm76_vm0, %v4861_v13, 0.0 }
0x101a   :  { %1935 = vadd.xlane.f32.xlu0 %v1934_v20 }
0x10a6   :  { %v1939_v21 = vpop.xlane.xlu1 %1938 }
0x10a7   :  { %v1941_v50 = vmul.f32 0.03125, %v1939_v21  ;;  %v1936_v22 = vpop.xlane.xlu0 %1935 }
0x10a8   :  { %v1940_v24 = vmul.f32 0.03125, %v1936_v22 }
0x10a9   :  { %v1943_v2 = vsub.f32 %v4859_v12, %v1941_v50 }
0x10aa   :  { %v1942_v4 = vsub.f32 %v4861_v13, %v1940_v24 }
0x10ab   :  { %v1945_v26 = vmul.f32 %v1943_v2, %v1943_v2  ;;  %v1973_v49 = vmul.f32 %v3866_v48, %v1943_v2 }
0x10ac   :  { %v1944_v14 = vmul.f32 %v1942_v4, %v1942_v4  ;;  %v1972_v53 = vmul.f32 %v3866_v48, %v1942_v4 }
0x10ad   :  { %v1949_v15 = vsel %vm76_vm0, %v1945_v26, 0.0 }
0x10ae   :  { %1950 = vadd.xlane.f32.xlu1 %v1949_v15  ;;  %v1946_v16 = vsel %vm76_vm0, %v1944_v14, 0.0 }
0x10af   :  { %1947 = vadd.xlane.f32.xlu0 %v1946_v16 }
0x113b   :  { %v1951_v31 = vpop.xlane.xlu1 %1950 }
0x113c   :  { %v1953_v32 = vmul.f32 0.032258064, %v1951_v31  ;;  %v1948_v33 = vpop.xlane.xlu0 %1947 }
0x113d   :  { %v1952_v34 = vmul.f32 0.032258064, %v1948_v33 }
0x113e   :  { %4461 = vrsqrt.f32 %v1953_v32  ;;  %vm1963_vm14 = vcmp.eq.f32.partialorder %v1953_v32, inf  ;;  %v1966_v37 = vand.u32 2147483648, %v1953_v32  ;;  %vm1965_vm15 = vcmp.eq.f32.partialorder %v1953_v32, 0.0 }
0x113f   :  { %4463 = vrsqrt.f32 %v1952_v34  ;;  %vm1956_vm1 = vcmp.eq.f32.partialorder %v1952_v34, inf  ;;  %v1959_v39 = vand.u32 2147483648, %v1952_v34  ;;  %vm1958_vm2 = vcmp.eq.f32.partialorder %v1952_v34, 0.0 }
0x1148   :  { %v4462_v35 = vpop.eup %4461 }
0x1149   :  { %v4464_v52 = vpop.eup %4463  ;;  %v1962_v36 = vmul.f32 %v4462_v35, %v1953_v32 }
0x114a   :  { %v1955_v23 = vmul.f32 %v4464_v52, %v1952_v34 }
0x114b   :  { %v1964_v38 = vsel %vm1963_vm14, %v1953_v32, %v1962_v36 }
0x114c   :  { %v1967_v40 = vsel %vm1965_vm15, %v1966_v37, %v1964_v38  ;;  %v1957_v42 = vsel %vm1956_vm1, %v1952_v34, %v1955_v23 }
0x114d   :  { %v1975_v44 = vadd.f32 1e-06, %v1967_v40  ;;  %v1960_v45 = vsel %vm1958_vm2, %v1959_v39, %v1957_v42 }
0x114e   :  { %v1974_v46 = vadd.f32 1e-06, %v1960_v45 }
0x114f   :  { %4465 = vrcp.f32 %v1975_v44 }
0x1150   :  { %4467 = vrcp.f32 %v1974_v46 }
0x1159   :  { %v4466_v51 = vpop.eup %4465 }
0x115a   :  { %v4468_v54 = vpop.eup %4467  ;;  %v1979_v56 = vmul.f32 %v4466_v51, %v1973_v49 }
0x115b   :  { %v1977_v57 = vmul.f32 %v4468_v54, %v1972_v53 }
0x115c   :  { %v1985_v59 = vadd.f32 %v3867_v55, %v1979_v56 }
0x115d   :  { %v1984_v58 = vadd.f32 %v3867_v55, %v1977_v57 }
0x115f   :  { %4168 = vmatprep.mubr.msk.f32.mxu1 %vm76_vm0, %v1984_v58 }
0x1160   :  { %4169 = vmatmul.mubr.msk.f32.vlgmr.msra.gmra.mrb[22].mxu1 %vm76_vm0, %v1985_v59 }
0x1161   :  { %4173 = vmatprep.mubr.msk.f32.mxu1 %vm4569_vm5, %v4568_v47 }
0x1233   :  { %v4170_v41 = vpop.f32.mrb[22].mxu1 }
0x1234   :  { %v4890_v61 = vadd.f32 %v4170_v41, %v3868_v60  ;;  %v2062_v62 = vpop.f32.mrb[23].mxu1 }
0x1235   :  { %v4892_v63 = vadd.f32 %v3868_v60, %v2062_v62 }
0x1236   :  { %2149 = vrot.lane.b32.xlu1 %v4890_v61, %s4570_s1 }
0x1237   :  { %2072 = vrot.lane.b32.xlu0 %v4892_v63, %s4570_s1 }
0x12a8   :  { %v2150_v5 = vpop.permute.xlu1 %2149 }
0x12a9   :  { %v2073_v43 = vpop.permute.xlu0 %2072 }
0x12aa   :  { %4172 = vmatpush3.xpose.msk.msra.mxu1 %vm228_vm6, %v2073_v43 }
0x12ab   :  { %4176 = vmatprep.subr.mxu1 %v4568_v47 }
0x12ad   :  { %4174 = vmatmul.mubr.msk.f32.vlgmr.msra.gmra.mrb[24].mxu1 %vm228_vm6, %v4892_v63 }
0x12ae   :  { %4177 = vmatpush3.xpose.msk.msra.mxu1 %vm228_vm6, %v2150_v5  ;;  %4178 = vmatprep.mubr.msk.f32.mxu1 %vm4569_vm5, %v4568_v47 }
0x12af   :  { %4186 = vmatprep.subr.mxu1 %v4568_v47 }
0x12b1   :  { %4179 = vmatmul.mubr.msk.f32.vlgmr.msra.gmra.mrb[26].mxu1 %vm228_vm6, %v4890_v61 }
0x12b2   :  { %4188 = vmatprep.mubr.msk.f32.mxu1 %vm4569_vm5, %v4568_v47 }
0x1380   :  { %v2144_v6 = vpop.f32.mrb[24].mxu1 }
0x1381   :  { %v2145_v7 = vadd.f32 %v2144_v6, %v4679_v3  ;;  %v4175_v9 = vpop.f32.mrb[25].mxu1 }
0x1383   :  { %v2225_v10 = vsel %vm228_vm6, %v2145_v7, -inf }
0x1384   :  { %2226 = vmax.xlane.f32.xlu1 %v2225_v10  ;;  %v2221_v1 = vpop.f32.mrb[26].mxu1 }
0x1385   :  { %v2222_v0 = vadd.f32 %v2221_v1, %v4682_v8  ;;  %v4180_v11 = vpop.f32.mrb[27].mxu1 }
0x1387   :  { %v2228_v18 = vsel %vm228_vm6, %v2222_v0, -inf }
0x1388   :  { %2229 = vmax.xlane.f32.xlu0 %v2228_v18 }
0x1395   :  { %2323 = vrot.lane.b32.xlu1 %v4890_v61, %s4572_s0 }
0x1399   :  { %2401 = vrot.lane.b32.xlu1 %v4892_v63, %s4573_s29 }
0x139d   :  { %2479 = vrot.lane.b32.xlu1 %v4890_v61, %s4573_s29 }
0x139e   :  { %2247 = vrot.lane.b32.xlu0 %v4892_v63, %s4572_s0 }
0x1411   :  { %v2227_v20 = vpop.xlane.xlu1 %2226 }
0x1412   :  { %v2231_v21 = vsub.f32 %v2145_v7, %v2227_v20 }
0x1414   :  { %v2233_v50 = vmul.f32 1.442695, %v2231_v21 }
0x1415   :  { %v2324_v22 = vpop.permute.xlu1 %2323  ;;  %v2230_v24 = vpop.xlane.xlu0 %2229 }
0x1416   :  { %4469 = vpow2.f32 %v2233_v50  ;;  %v2232_v2 = vsub.f32 %v2222_v0, %v2230_v24  ;;  %4187 = vmatpush3.msra.mxu1 %v2324_v22 }
0x1417   :  { %4196 = vmatprep.subr.mxu1 %v4568_v47 }
0x1418   :  { %v2235_v4 = vmul.f32 1.442695, %v2232_v2 }
0x1419   :  { %v2248_v26 = vpop.permute.xlu0 %2247  ;;  %v2402_v30 = vpop.permute.xlu1 %2401 }
0x141a   :  { %4471 = vpow2.f32 %v2235_v4  ;;  %4182 = vmatpush3.msra.mxu0 %v2248_v26 }
0x141b   :  { %4191 = vmatprep.subr.mxu0 %v4568_v47 }
0x141d   :  { %v2480_v31 = vpop.permute.xlu1 %2479 }
0x1420   :  { %v4470_v14 = vpop.eup %4469 }
0x1421   :  { %v2237_v15 = vsel %vm228_vm6, %v4470_v14, 0.0 }
0x1422   :  { %2238 = vadd.xlane.f32.xlu0 %v2237_v15 }
0x1424   :  { %v4472_v16 = vpop.eup %4471 }
0x1425   :  { %v2240_v27 = vsel %vm228_vm6, %v4472_v16, 0.0 }
0x1426   :  { %2241 = vadd.xlane.f32.xlu1 %v2240_v27 }
0x1437   :  { %2477 = vrot.lane.b32.xlu1 %v4890_v61, %s4574_s30 }
0x1438   :  { %2399 = vrot.lane.b32.xlu0 %v4892_v63, %s4574_s30 }
0x14af   :  { %v2239_v32 = vpop.xlane.xlu0 %2238 }
0x14b0   :  { %4473 = vrcp.f32 %v2239_v32 }
0x14b3   :  { %v2242_v33 = vpop.xlane.xlu1 %2241  ;;  %v2400_v37 = vpop.permute.xlu0 %2399 }
0x14b4   :  { %4475 = vrcp.f32 %v2242_v33 }
0x14b7   :  { %v2478_v23 = vpop.permute.xlu1 %2477 }
0x14ba   :  { %v4474_v34 = vpop.eup %4473 }
0x14bb   :  { %v2245_v35 = vmul.f32 %v4474_v34, %v4470_v14 }
0x14bd   :  { %4184 = vmatmul.mubr.msk.f32.vlgmr.msra.gmra.mrb[18].mxu0 %vm228_vm6, %v2245_v35 }
0x14be   :  { %v4476_v52 = vpop.eup %4475  ;;  %4192 = vmatpush3.xpose.msk.msra.mxu0 %vm228_vm6, %v2402_v30  ;;  %4193 = vmatprep.mubr.msk.f32.mxu0 %vm4569_vm5, %v4568_v47 }
0x14bf   :  { %v2246_v36 = vmul.f32 %v4476_v52, %v4472_v16  ;;  %4201 = vmatprep.subr.mxu0 %v4568_v47 }
0x14c1   :  { %4189 = vmatmul.mubr.msk.f32.vlgmr.msra.gmra.mrb[28].mxu1 %vm228_vm6, %v2246_v36  ;;  %4194 = vmatmul.mubr.msk.f32.vlgmr.msra.gmra.mrb[20].mxu0 %vm228_vm6, %v2400_v37 }
0x14c2   :  { %4197 = vmatpush3.xpose.msk.msra.mxu1 %vm228_vm6, %v2480_v31  ;;  %4198 = vmatprep.mubr.msk.f32.mxu1 %vm4569_vm5, %v4568_v47 }
0x14c3   :  { %4206 = vmatprep.subr.mxu1 %v4568_v47  ;;  %4203 = vmatprep.mubr.msk.f32.mxu0 %vm4569_vm5, %v4568_v47 }
0x14c5   :  { %4199 = vmatmul.mubr.msk.f32.vlgmr.msra.gmra.mrb[30].mxu1 %vm228_vm6, %v2478_v23 }
0x14c6   :  { %4208 = vmatprep.mubr.msk.f32.mxu1 %vm4569_vm5, %v4568_v47 }
0x1590   :  { %v4946_v38 = vpop.f32.mrb[18].mxu0 }
0x1591   :  { %v4185_v39 = vpop.f32.mrb[19].mxu0 }
0x1594   :  { %v4948_v40 = vpop.f32.mrb[28].mxu1  ;;  %v2473_v42 = vpop.f32.mrb[20].mxu0 }
0x1595   :  { %v2474_v44 = vadd.f32 %v2473_v42, %v4679_v3  ;;  %v4190_v45 = vpop.f32.mrb[29].mxu1  ;;  %v4195_v46 = vpop.f32.mrb[21].mxu0 }
0x1597   :  { %v2555_v48 = vsel %vm228_vm6, %v2474_v44, -inf }
0x1598   :  { %2556 = vmax.xlane.f32.xlu0 %v2555_v48  ;;  %v2551_v49 = vpop.f32.mrb[30].mxu1 }
0x1599   :  { %v2552_v51 = vadd.f32 %v2551_v49, %v4682_v8  ;;  %v4200_v53 = vpop.f32.mrb[31].mxu1 }
0x159b   :  { %v2558_v54 = vsel %vm228_vm6, %v2552_v51, -inf }
0x159c   :  { %2559 = vmax.xlane.f32.xlu1 %v2558_v54 }
0x15ad   :  { %2653 = vrot.lane.b32.xlu1 %v4890_v61, %s4575_s3 }
0x15ae   :  { %2577 = vrot.lane.b32.xlu0 %v4892_v63, %s4575_s3 }
0x15b1   :  { %2731 = vrot.lane.b32.xlu1 %v4892_v63, %s4576_s4 }
0x15b5   :  { %2809 = vrot.lane.b32.xlu1 %v4890_v61, %s4576_s4 }
0x15b9   :  { %2807 = vrot.lane.b32.xlu1 %v4890_v61, %s4577_s5 }
0x1625   :  { %v2557_v55 = vpop.xlane.xlu0 %2556 }
0x1626   :  { %v2561_v56 = vsub.f32 %v2474_v44, %v2557_v55 }
0x1628   :  { %v2563_v57 = vmul.f32 1.442695, %v2561_v56 }
0x1629   :  { %v2578_v58 = vpop.permute.xlu0 %2577  ;;  %v2560_v59 = vpop.xlane.xlu1 %2559 }
0x162a   :  { %4477 = vpow2.f32 %v2563_v57  ;;  %v2562_v60 = vsub.f32 %v2552_v51, %v2560_v59  ;;  %4202 = vmatpush3.msra.mxu0 %v2578_v58 }
0x162b   :  { %4211 = vmatprep.subr.mxu0 %v4568_v47 }
0x162c   :  { %v2565_v41 = vmul.f32 1.442695, %v2562_v60 }
0x162d   :  { %v2654_v62 = vpop.permute.xlu1 %2653 }
0x162e   :  { %4479 = vpow2.f32 %v2565_v41  ;;  %4207 = vmatpush3.msra.mxu1 %v2654_v62 }
0x162f   :  { %4216 = vmatprep.subr.mxu1 %v4568_v47 }
0x1631   :  { %v2732_v1 = vpop.permute.xlu1 %2731 }
0x1634   :  { %v4478_v43 = vpop.eup %4477 }
0x1635   :  { %v2567_v5 = vsel %vm228_vm6, %v4478_v43, 0.0  ;;  %v2810_v20 = vpop.permute.xlu1 %2809 }
0x1636   :  { %2568 = vadd.xlane.f32.xlu0 %v2567_v5 }
0x1638   :  { %v4480_v6 = vpop.eup %4479 }
0x1639   :  { %v2570_v7 = vsel %vm228_vm6, %v4480_v6, 0.0  ;;  %v2808_v22 = vpop.permute.xlu1 %2807 }
0x163a   :  { %2571 = vadd.xlane.f32.xlu0 %v2570_v7 }
0x1650   :  { %2729 = vrot.lane.b32.xlu0 %v4892_v63, %s4577_s5 }
0x16c3   :  { %v2569_v9 = vpop.xlane.xlu0 %2568 }
0x16c4   :  { %4481 = vrcp.f32 %v2569_v9 }
0x16c7   :  { %v2572_v10 = vpop.xlane.xlu0 %2571 }
0x16c8   :  { %4483 = vrcp.f32 %v2572_v10 }
0x16cb   :  { %v2730_v50 = vpop.permute.xlu0 %2729 }
0x16ce   :  { %v4482_v0 = vpop.eup %4481 }
0x16cf   :  { %v2575_v11 = vmul.f32 %v4482_v0, %v4478_v43 }
0x16d1   :  { %4204 = vmatmul.mubr.msk.f32.vlgmr.msra.gmra.mrb[22].mxu0 %vm228_vm6, %v2575_v11 }
0x16d2   :  { %v4484_v18 = vpop.eup %4483  ;;  %4212 = vmatpush3.xpose.msk.msra.mxu0 %vm228_vm6, %v2732_v1  ;;  %4213 = vmatprep.mubr.msk.f32.mxu0 %vm4569_vm5, %v4568_v47 }
0x16d3   :  { %v2576_v21 = vmul.f32 %v4484_v18, %v4480_v6  ;;  %4221 = vmatprep.subr.mxu0 %v4568_v47 }
0x16d5   :  { %4209 = vmatmul.mubr.msk.f32.vlgmr.msra.gmra.mrb[32].mxu1 %vm228_vm6, %v2576_v21  ;;  %4214 = vmatmul.mubr.msk.f32.vlgmr.msra.gmra.mrb[24].mxu0 %vm228_vm6, %v2730_v50 }
0x16d6   :  { %4217 = vmatpush3.xpose.msk.msra.mxu1 %vm228_vm6, %v2810_v20  ;;  %4218 = vmatprep.mubr.msk.f32.mxu1 %vm4569_vm5, %v4568_v47 }
0x16d7   :  { %4226 = vmatprep.subr.mxu1 %v4568_v47  ;;  %4223 = vmatprep.mubr.msk.f32.mxu0 %vm4569_vm5, %v4568_v47 }
0x16d9   :  { %4219 = vmatmul.mubr.msk.f32.vlgmr.msra.gmra.mrb[34].mxu1 %vm228_vm6, %v2808_v22 }
0x16da   :  { %4228 = vmatprep.mubr.msk.f32.mxu1 %vm4569_vm5, %v4568_v47 }
0x17a4   :  { %v4986_v24 = vpop.f32.mrb[22].mxu0 }
0x17a5   :  { %v4205_v2 = vpop.f32.mrb[23].mxu0 }
0x17a8   :  { %v4988_v4 = vpop.f32.mrb[32].mxu1  ;;  %v2803_v26 = vpop.f32.mrb[24].mxu0 }
0x17a9   :  { %v2804_v14 = vadd.f32 %v2803_v26, %v4679_v3  ;;  %v4210_v15 = vpop.f32.mrb[33].mxu1  ;;  %v4215_v16 = vpop.f32.mrb[25].mxu0 }
0x17ab   :  { %v2885_v27 = vsel %vm228_vm6, %v2804_v14, -inf }
0x17ac   :  { %2886 = vmax.xlane.f32.xlu0 %v2885_v27  ;;  %v2881_v30 = vpop.f32.mrb[34].mxu1 }
0x17ad   :  { %v2882_v31 = vadd.f32 %v2881_v30, %v4682_v8  ;;  %v4220_v32 = vpop.f32.mrb[35].mxu1 }
0x17af   :  { %v2888_v33 = vsel %vm228_vm6, %v2882_v31, -inf }
0x17b0   :  { %2889 = vmax.xlane.f32.xlu1 %v2888_v33 }
0x17c1   :  { %2983 = vrot.lane.b32.xlu1 %v4890_v61, %s4578_s6 }
0x17c2   :  { %2907 = vrot.lane.b32.xlu0 %v4892_v63, %s4578_s6 }
0x17c5   :  { %3061 = vrot.lane.b32.xlu1 %v4892_v63, %s4579_s7 }
0x17c9   :  { %3139 = vrot.lane.b32.xlu1 %v4890_v61, %s4579_s7 }
0x17cd   :  { %3137 = vrot.lane.b32.xlu1 %v4890_v61, %s4580_s8 }
0x1839   :  { %v2887_v34 = vpop.xlane.xlu0 %2886 }
0x183a   :  { %v2891_v35 = vsub.f32 %v2804_v14, %v2887_v34 }
0x183c   :  { %v2893_v52 = vmul.f32 1.442695, %v2891_v35 }
0x183d   :  { %v2908_v36 = vpop.permute.xlu0 %2907  ;;  %v2890_v37 = vpop.xlane.xlu1 %2889 }
0x183e   :  { %4485 = vpow2.f32 %v2893_v52  ;;  %v2892_v23 = vsub.f32 %v2882_v31, %v2890_v37  ;;  %4222 = vmatpush3.msra.mxu0 %v2908_v36 }
0x183f   :  { %4231 = vmatprep.subr.mxu0 %v4568_v47 }
0x1840   :  { %v2895_v39 = vmul.f32 1.442695, %v2892_v23 }
0x1841   :  { %v2984_v42 = vpop.permute.xlu1 %2983 }
0x1842   :  { %4487 = vpow2.f32 %v2895_v39  ;;  %4227 = vmatpush3.msra.mxu1 %v2984_v42 }
0x1843   :  { %4236 = vmatprep.subr.mxu1 %v4568_v47 }
0x1845   :  { %v3062_v53 = vpop.permute.xlu1 %3061 }
0x1848   :  { %v4486_v44 = vpop.eup %4485 }
0x1849   :  { %v2897_v45 = vsel %vm228_vm6, %v4486_v44, 0.0  ;;  %v3140_v57 = vpop.permute.xlu1 %3139 }
0x184a   :  { %2898 = vadd.xlane.f32.xlu0 %v2897_v45 }
0x184c   :  { %v4488_v46 = vpop.eup %4487 }
0x184d   :  { %v2900_v48 = vsel %vm228_vm6, %v4488_v46, 0.0  ;;  %v3138_v60 = vpop.permute.xlu1 %3137 }
0x184e   :  { %2901 = vadd.xlane.f32.xlu0 %v2900_v48 }
0x1864   :  { %3059 = vrot.lane.b32.xlu0 %v4892_v63, %s4580_s8 }
0x18d7   :  { %v2899_v49 = vpop.xlane.xlu0 %2898 }
0x18d8   :  { %4489 = vrcp.f32 %v2899_v49 }
0x18db   :  { %v2902_v51 = vpop.xlane.xlu0 %2901 }
0x18dc   :  { %4491 = vrcp.f32 %v2902_v51 }
0x18df   :  { %v3060_v59 = vpop.permute.xlu0 %3059 }
0x18e2   :  { %v4490_v54 = vpop.eup %4489 }
0x18e3   :  { %v2905_v55 = vmul.f32 %v4490_v54, %v4486_v44 }
0x18e5   :  { %4224 = vmatmul.mubr.msk.f32.vlgmr.msra.gmra.mrb[26].mxu0 %vm228_vm6, %v2905_v55 }
0x18e6   :  { %v4492_v56 = vpop.eup %4491  ;;  %4232 = vmatpush3.xpose.msk.msra.mxu0 %vm228_vm6, %v3062_v53  ;;  %4233 = vmatprep.mubr.msk.f32.mxu0 %vm4569_vm5, %v4568_v47 }
0x18e7   :  { %v2906_v58 = vmul.f32 %v4492_v56, %v4488_v46  ;;  %4241 = vmatprep.subr.mxu0 %v4568_v47  ;;  %v3897_v56 = vld [vmem:[#allocation2 + $0x10e] ss:$0 sm:$0xff] }
0x18e9   :  { %4229 = vmatmul.mubr.msk.f32.vlgmr.msra.gmra.mrb[36].mxu1 %vm228_vm6, %v2906_v58  ;;  %4234 = vmatmul.mubr.msk.f32.vlgmr.msra.gmra.mrb[28].mxu0 %vm228_vm6, %v3060_v59 }
0x18ea   :  { %4237 = vmatpush3.xpose.msk.msra.mxu1 %vm228_vm6, %v3140_v57  ;;  %4238 = vmatprep.mubr.msk.f32.mxu1 %vm4569_vm5, %v4568_v47 }
0x18eb   :  { %4246 = vmatprep.subr.mxu1 %v4568_v47  ;;  %4243 = vmatprep.mubr.msk.f32.mxu0 %vm4569_vm5, %v4568_v47 }
0x18ed   :  { %4239 = vmatmul.mubr.msk.f32.vlgmr.msra.gmra.mrb[38].mxu1 %vm228_vm6, %v3138_v60 }
0x18ee   :  { %4248 = vmatprep.mubr.msk.f32.mxu1 %vm4569_vm5, %v4568_v47  ;;  %v4403_v47 = vpack.i.bf16 %v4873_v19, %v4871_v17 }
0x19b8   :  { %v2979_v41 = vpop.f32.mrb[26].mxu0 }
0x19b9   :  { %v4225_v62 = vpop.f32.mrb[27].mxu0 }
0x19bc   :  { %v3055_v43 = vpop.f32.mrb[36].mxu1  ;;  %v3133_v5 = vpop.f32.mrb[28].mxu0 }
0x19bd   :  { %v3134_v6 = vadd.f32 %v3133_v5, %v4679_v3  ;;  %v4230_v7 = vpop.f32.mrb[37].mxu1  ;;  %v4235_v9 = vpop.f32.mrb[29].mxu0 }
0x19bf   :  { %v3215_v10 = vsel %vm228_vm6, %v3134_v6, -inf }
0x19c0   :  { %3216 = vmax.xlane.f32.xlu0 %v3215_v10  ;;  %v3211_v1 = vpop.f32.mrb[38].mxu1 }
0x19c1   :  { %v3212_v0 = vadd.f32 %v3211_v1, %v4682_v8  ;;  %v4240_v11 = vpop.f32.mrb[39].mxu1 }
0x19c2   :  { %v1914_v11 = vld [vmem:[#allocation2 + $0xa8] sm:$0xff] }
0x19c3   :  { %v3218_v18 = vsel %vm228_vm6, %v3212_v0, -inf }
0x19c4   :  { %3219 = vmax.xlane.f32.xlu1 %v3218_v18  ;;  %v1915_v18 = vld [vmem:[#allocation2 + $0xb0] sm:$0xff] }
0x19d5   :  { %3313 = vrot.lane.b32.xlu1 %v4890_v61, %s4581_s9 }
0x19d9   :  { %4404 = vrot.lane.b32.xlu1 %v4403_v47, %s4582_s10  ;;  %v1916_v47 = vld [vmem:[#allocation2 + $0xb8] sm:$0xff] }
0x19dd   :  { %4409 = vrot.lane.b32.xlu1 %v4408_v29, %s4582_s10 }
0x19e1   :  { %3393 = vrot.lane.b32.xlu1 %v4988_v4, %s4567_s20 }
0x19e5   :  { %3401 = vrot.lane.b32.xlu1 %v3055_v43, %s4583_s11 }
0x1a4d   :  { %v3217_v3 = vpop.xlane.xlu0 %3216 }
0x1a4e   :  { %v3221_v8 = vsub.f32 %v3134_v6, %v3217_v3  ;;  %v4348_v3 = vpack.c.bf16 %v1915_v18, %v1914_v11 }
0x1a50   :  { %v3223_v20 = vmul.f32 1.442695, %v3221_v8  ;;  %v1917_v8 = vld [vmem:[#allocation2 + $0xc0] sm:$0xff] }
0x1a51   :  { %v3220_v21 = vpop.xlane.xlu1 %3219 }
0x1a52   :  { %4493 = vpow2.f32 %v3223_v20  ;;  %v3222_v61 = vsub.f32 %v3212_v0, %v3220_v21  ;;  %v4352_v20 = vpack.c.bf16 %v1917_v8, %v1916_v47  ;;  %v1918_v21 = vld [vmem:[#allocation2 + $0xc8] sm:$0xff] }
0x1a54   :  { %v3225_v50 = vmul.f32 1.442695, %v3222_v61  ;;  %v1919_v61 = vld [vmem:[#allocation2 + $0xd0] sm:$0xff] }
0x1a55   :  { %v3314_v17 = vpop.permute.xlu1 %3313 }
0x1a56   :  { %4495 = vpow2.f32 %v3225_v50  ;;  %4247 = vmatpush3.msra.mxu1 %v3314_v17  ;;  %v1920_v50 = vld [vmem:[#allocation2 + $0xd8] sm:$0xff]  ;;  %v4356_v17 = vpack.c.bf16 %v1919_v61, %v1918_v21 }
0x1a57   :  { %4349 = vmatprep.subr.bf16.mxu1 %v4348_v3 }
0x1a59   :  { %v4405_v2 = vpop.permute.xlu1 %4404 }
0x1a5a   :  { %v4407_v4 = vunpack.i.h.bf16 %v4405_v2  ;;  %v4406_v26 = vunpack.i.l.bf16 %v4405_v2 }
0x1a5c   :  { %v4494_v19 = vpop.eup %4493  ;;  %v4340_v15 = vpack.c.bf16 %v4407_v4, %v4406_v26 }
0x1a5d   :  { %v3227_v22 = vsel %vm228_vm6, %v4494_v19, 0.0  ;;  %v4410_v16 = vpop.permute.xlu1 %4409 }
0x1a5e   :  { %3228 = vadd.xlane.f32.xlu0 %v3227_v22  ;;  %v4412_v27 = vunpack.i.h.bf16 %v4410_v16  ;;  %v4411_v30 = vunpack.i.l.bf16 %v4410_v16 }
0x1a60   :  { %v4496_v25 = vpop.eup %4495  ;;  %v4344_v32 = vpack.c.bf16 %v4412_v27, %v4411_v30 }
0x1a61   :  { %v3230_v28 = vsel %vm228_vm6, %v4496_v25, 0.0  ;;  %v3394_v39 = vpop.permute.xlu1 %3393 }
0x1a62   :  { %3231 = vadd.xlane.f32.xlu0 %v3230_v28  ;;  %v3414_v51 = vsel %vm228_vm6, %v4948_v40, %v3394_v39  ;;  %v1923_v28 = vld [vmem:[#allocation2 + $0xf0] sm:$0xff]  ;;  %v3899_v39 = vld [vmem:[#allocation2 + $0x10d] ss:$0 sm:$0xff] }
0x1a65   :  { %v3402_v45 = vpop.permute.xlu1 %3401 }
0x1a66   :  { %v3416_v53 = vsel %vm1570_vm8, %v3414_v51, %v3402_v45  ;;  %v1924_v51 = vld [vmem:[#allocation2 + $0xf8] sm:$0xff] }
0x1a78   :  { %3237 = vrot.lane.b32.xlu0 %v4892_v63, %s4581_s9 }
0x1a7c   :  { %3391 = vrot.lane.b32.xlu0 %v4986_v24, %s4567_s20 }
0x1a80   :  { %3399 = vrot.lane.b32.xlu0 %v2979_v41, %s4583_s11 }
0x1aeb   :  { %v3229_v29 = vpop.xlane.xlu0 %3228 }
0x1aec   :  { %4497 = vrcp.f32 %v3229_v29 }
0x1aef   :  { %v3232_v14 = vpop.xlane.xlu0 %3231 }
0x1af0   :  { %4499 = vrcp.f32 %v3232_v14 }
0x1af3   :  { %v3238_v31 = vpop.permute.xlu0 %3237 }
0x1af4   :  { %4242 = vmatpush3.msra.mxu0 %v3238_v31 }
0x1af5   :  { %4341 = vmatprep.subr.bf16.mxu0 %v4340_v15 }
0x1af6   :  { %v4498_v63 = vpop.eup %4497 }
0x1af7   :  { %v3235_v33 = vmul.f32 %v4498_v63, %v4494_v19  ;;  %v3392_v23 = vpop.permute.xlu0 %3391  ;;  %v1921_v19 = vld [vmem:[#allocation2 + $0xe0] sm:$0xff] }
0x1af8   :  { %v3413_v44 = vsel %vm228_vm6, %v4946_v38, %v3392_v23  ;;  %v4360_v22 = vpack.c.bf16 %v1921_v19, %v1920_v50 }
0x1af9   :  { %4244 = vmatmul.mubr.msk.f32.vlgmr.msra.gmra.mrb[30].mxu0 %vm228_vm6, %v3235_v33 }
0x1afa   :  { %v4500_v24 = vpop.eup %4499  ;;  %4343 = vmatpush3.bf16.msra.mxu0 %v4340_v15 }
0x1afb   :  { %v3236_v34 = vmul.f32 %v4500_v24, %v4496_v25  ;;  %4345 = vmatprep.subr.bf16.mxu0 %v4344_v32  ;;  %v3400_v42 = vpop.permute.xlu0 %3399  ;;  %v1922_v25 = vld [vmem:[#allocation2 + $0xe8] sm:$0xff] }
0x1afc   :  { %v3415_v46 = vsel %vm1570_vm8, %v3413_v44, %v3400_v42  ;;  %v4364_v29 = vpack.c.bf16 %v1923_v28, %v1922_v25 }
0x1afd   :  { %4249 = vmatmul.mubr.msk.f32.vlgmr.msra.gmra.mrb[40].mxu1 %vm228_vm6, %v3236_v34 }
0x1afe   :  { %4347 = vmatpush3.bf16.msra.mxu0 %v4344_v32  ;;  %4351 = vmatpush3.bf16.msra.mxu1 %v4348_v3 }
0x1aff   :  { %4353 = vmatprep.subr.bf16.mxu1 %v4352_v20  ;;  %4357 = vmatprep.subr.bf16.mxu0 %v4356_v17 }
0x1b02   :  { %4355 = vmatpush3.bf16.msra.mxu1 %v4352_v20 }
0x1bcc   :  { %v3309_v35 = vpop.f32.mrb[30].mxu0 }
0x1bcd   :  { %3407 = vrot.lane.b32.xlu0 %v3309_v35, %s4584_s12  ;;  %v4245_v52 = vpop.f32.mrb[31].mxu0 }
0x1bd0   :  { %v3385_v36 = vpop.f32.mrb[40].mxu1 }
0x1bd1   :  { %3409 = vrot.lane.b32.xlu1 %v3385_v36, %s4584_s12  ;;  %v4250_v37 = vpop.f32.mrb[41].mxu1  ;;  %v3898_v36 = vld [vmem:[#allocation2 + $0x10c] ss:$0 sm:$0xff] }
0x1c3f   :  { %v3408_v48 = vpop.permute.xlu0 %3407 }
0x1c40   :  { %v3417_v49 = vsel %vm1573_vm7, %v3415_v46, %v3408_v48 }
0x1c41   :  { %4259 = vmatprep.mubr.msk.f32.mxu0 %vm76_vm0, %v3417_v49 }
0x1c43   :  { %v3410_v54 = vpop.permute.xlu1 %3409 }
0x1c44   :  { %v3418_v55 = vsel %vm1573_vm7, %v3416_v53, %v3410_v54  ;;  %v1925_v53 = vld [vmem:[#allocation2 + $0x100] sm:$0xff] }
0x1c45   :  { %4260 = vmatmul.mubr.msk.f32.vlgmr.msra.gmra.mrb[32].mxu0 %vm76_vm0, %v3418_v55  ;;  %v4368_v54 = vpack.c.bf16 %v1925_v53, %v1924_v51  ;;  %v3900_v55 = vld [vmem:[#allocation2 + $0x109] ss:$0 sm:$0xff] }
0x1c46   :  { %4359 = vmatpush3.bf16.msra.mxu0 %v4356_v17 }
0x1c47   :  { %4361 = vmatprep.subr.bf16.mxu0 %v4360_v22 }
0x1c4a   :  { %4363 = vmatpush3.bf16.msra.mxu0 %v4360_v22 }
0x1c4b   :  { %4365 = vmatprep.subr.bf16.mxu0 %v4364_v29 }
0x1c4e   :  { %4367 = vmatpush3.bf16.msra.mxu0 %v4364_v29 }
0x1c4f   :  { %4369 = vmatprep.subr.bf16.mxu0 %v4368_v54 }
0x1c52   :  { %4371 = vmatpush3.bf16.msra.mxu0 %v4368_v54 }
0x1d18   :  { %v4261_v38 = vpop.f32.mrb[32].mxu0 }
0x1d19   :  { %v3517_v57 = vadd.f32 %v4261_v38, %v4859_v12  ;;  %v3507_v58 = vpop.f32.mrb[33].mxu0 }
0x1d1a   :  { %v3516_v59 = vadd.f32 %v3507_v58, %v4861_v13 }
0x1d1b   :  { %v5065_v60 = vadd.f32 %v3897_v56, %v3517_v57 }
0x1d1c   :  { %v5067_v41 = vadd.f32 %v3897_v56, %v3516_v59 }
0x1d1d   :  { %v3527_v40 = vsel %vm76_vm0, %v5065_v60, 0.0 }
0x1d1e   :  { %3528 = vadd.xlane.f32.xlu1 %v3527_v40  ;;  %v3524_v62 = vsel %vm76_vm0, %v5067_v41, 0.0 }
0x1d1f   :  { %3525 = vadd.xlane.f32.xlu0 %v3524_v62  ;;  %v3905_v62 = vld [vmem:[#allocation2 + $0x10f] ss:$0 sm:$0xff] }
0x1dab   :  { %v3529_v43 = vpop.xlane.xlu1 %3528 }
0x1dac   :  { %v3531_v5 = vmul.f32 0.03125, %v3529_v43  ;;  %v3526_v6 = vpop.xlane.xlu0 %3525 }
0x1dad   :  { %v3530_v7 = vmul.f32 0.03125, %v3526_v6 }
0x1dae   :  { %v3533_v12 = vsub.f32 %v5065_v60, %v3531_v5 }
0x1daf   :  { %v3532_v13 = vsub.f32 %v5067_v41, %v3530_v7 }
0x1db0   :  { %v3535_v1 = vmul.f32 %v3533_v12, %v3533_v12  ;;  %v3563_v44 = vmul.f32 %v3898_v36, %v3533_v12 }
0x1db1   :  { %v3534_v9 = vmul.f32 %v3532_v13, %v3532_v13  ;;  %v3562_v37 = vmul.f32 %v3898_v36, %v3532_v13 }
0x1db2   :  { %v3539_v0 = vsel %vm76_vm0, %v3535_v1, 0.0 }
0x1db3   :  { %v3536_v10 = vsel %vm76_vm0, %v3534_v9, 0.0 }
0x1db4   :  { %3537 = vadd.xlane.f32.xlu0 %v3536_v10 }
0x1db8   :  { %3540 = vadd.xlane.f32.xlu0 %v3539_v0 }
0x1e41   :  { %v3538_v2 = vpop.xlane.xlu0 %3537 }
0x1e42   :  { %v3542_v4 = vmul.f32 0.032258064, %v3538_v2 }
0x1e44   :  { %4501 = vrsqrt.f32 %v3542_v4  ;;  %vm3546_vm3 = vcmp.eq.f32.partialorder %v3542_v4, inf  ;;  %v3549_v27 = vand.u32 2147483648, %v3542_v4  ;;  %vm3548_vm4 = vcmp.eq.f32.partialorder %v3542_v4, 0.0 }
0x1e45   :  { %v3541_v26 = vpop.xlane.xlu0 %3540 }
0x1e46   :  { %v3543_v14 = vmul.f32 0.032258064, %v3541_v26 }
0x1e48   :  { %4503 = vrsqrt.f32 %v3543_v14  ;;  %vm3553_vm5 = vcmp.eq.f32.partialorder %v3543_v14, inf  ;;  %v3556_v24 = vand.u32 2147483648, %v3543_v14  ;;  %vm3555_vm6 = vcmp.eq.f32.partialorder %v3543_v14, 0.0 }
0x1e4e   :  { %v4502_v15 = vpop.eup %4501 }
0x1e4f   :  { %v3545_v16 = vmul.f32 %v4502_v15, %v3542_v4 }
0x1e51   :  { %v3547_v30 = vsel %vm3546_vm3, %v3542_v4, %v3545_v16 }
0x1e52   :  { %v4504_v31 = vpop.eup %4503  ;;  %v3550_v63 = vsel %vm3548_vm4, %v3549_v27, %v3547_v30  ;;  %v3906_v30 = vld [vmem:[#allocation2 + $0x110] ss:$0 sm:$0xff] }
0x1e53   :  { %v3552_v32 = vmul.f32 %v4504_v31, %v3543_v14  ;;  %v3564_v33 = vadd.f32 1e-06, %v3550_v63 }
0x1e55   :  { %v3554_v34 = vsel %vm3553_vm5, %v3543_v14, %v3552_v32  ;;  %4505 = vrcp.f32 %v3564_v33  ;;  %v3907_v33 = vld [vmem:[#allocation2 + $0x111] ss:$0 sm:$0xff] }
0x1e56   :  { %v3557_v35 = vsel %vm3555_vm6, %v3556_v24, %v3554_v34 }
0x1e57   :  { %v3565_v52 = vadd.f32 1e-06, %v3557_v35 }
0x1e59   :  { %4507 = vrcp.f32 %v3565_v52 }
0x1e5f   :  { %v4506_v23 = vpop.eup %4505 }
0x1e60   :  { %v3567_v42 = vmul.f32 %v4506_v23, %v3562_v37 }
0x1e62   :  { %v3574_v45 = vadd.f32 %v3899_v39, %v3567_v42 }
0x1e63   :  { %v4508_v46 = vpop.eup %4507 }
0x1e64   :  { %v3569_v48 = vmul.f32 %v4508_v46, %v3563_v44  ;;  %4270 = vmatprep.mubr.msk.f32.mxu1 %vm76_vm0, %v3574_v45 }
0x1e66   :  { %v3575_v49 = vadd.f32 %v3899_v39, %v3569_v48 }
0x1e68   :  { %4271 = vmatmul.mubr.msk.f32.vlgmr.msra.gmra.mrb[42].mxu1 %vm76_vm0, %v3575_v49 }
0x1f3b   :  { %v4272_v56 = vpop.f32.mrb[42].mxu1 }
0x1f3c   :  { %v3658_v38 = vadd.f32 %v4272_v56, %v3900_v55  ;;  %v3652_v57 = vpop.f32.mrb[43].mxu1 }
0x1f3d   :  { %v3653_v58 = vadd.f32 %v3900_v55, %v3652_v57 }
0x1f3e   :  { %v3662_v40 = vmax.f32 %v3658_v38, 0.0 }
0x1f3f   :  { %v3661_v59 = vmax.f32 %v3653_v58, 0.0 }
0x1f41   :  { %4289 = vmatprep.mubr.msk.f32.mxu0 %vm1820_vm13, %v3661_v59 }
0x1f42   :  { %4290 = vmatmul.mubr.msk.f32.vlgmr.msra.gmra.mrb[34].mxu0 %vm1820_vm13, %v3662_v40 }
0x2015   :  { %v4291_v43 = vpop.f32.mrb[34].mxu0 }
0x2016   :  { %v3745_v5 = vadd.f32 %v4291_v43, %v5065_v60  ;;  %v3735_v6 = vpop.f32.mrb[35].mxu0 }
0x2017   :  { %v3744_v7 = vadd.f32 %v3735_v6, %v5067_v41 }
0x2018   :  { %v3751_v12 = vadd.f32 %v3905_v62, %v3745_v5 }
0x2019   :  { %v3750_v13 = vadd.f32 %v3905_v62, %v3744_v7 }
0x201a   :  { %v3757_v9 = vsel %vm76_vm0, %v3751_v12, 0.0 }
0x201b   :  { %3758 = vadd.xlane.f32.xlu1 %v3757_v9  ;;  %v3754_v10 = vsel %vm76_vm0, %v3750_v13, 0.0 }
0x201c   :  { %3755 = vadd.xlane.f32.xlu0 %v3754_v10 }
0x20a8   :  { %v3759_v1 = vpop.xlane.xlu1 %3758 }
0x20a9   :  { %v3761_v0 = vmul.f32 0.03125, %v3759_v1  ;;  %v3756_v11 = vpop.xlane.xlu0 %3755 }
0x20aa   :  { %v3760_v18 = vmul.f32 0.03125, %v3756_v11 }
0x20ab   :  { %v3763_v47 = vsub.f32 %v3751_v12, %v3761_v0 }
0x20ac   :  { %v3762_v3 = vsub.f32 %v3750_v13, %v3760_v18 }
0x20ad   :  { %v3765_v8 = vmul.f32 %v3763_v47, %v3763_v47  ;;  %v3793_v31 = vmul.f32 %v3906_v30, %v3763_v47 }
0x20ae   :  { %v3764_v20 = vmul.f32 %v3762_v3, %v3762_v3  ;;  %v3792_v32 = vmul.f32 %v3906_v30, %v3762_v3 }
0x20af   :  { %v3769_v60 = vsel %vm76_vm0, %v3765_v8, 0.0 }
0x20b0   :  { %3770 = vadd.xlane.f32.xlu1 %v3769_v60  ;;  %v3766_v41 = vsel %vm76_vm0, %v3764_v20, 0.0 }
0x20b1   :  { %3767 = vadd.xlane.f32.xlu0 %v3766_v41 }
0x213d   :  { %v3771_v21 = vpop.xlane.xlu1 %3770 }
0x213e   :  { %v3773_v61 = vmul.f32 0.032258064, %v3771_v21  ;;  %v3768_v50 = vpop.xlane.xlu0 %3767 }
0x213f   :  { %v3772_v17 = vmul.f32 0.032258064, %v3768_v50 }
0x2140   :  { %4509 = vrsqrt.f32 %v3773_v61  ;;  %vm3783_vm7 = vcmp.eq.f32.partialorder %v3773_v61, inf  ;;  %v3786_v28 = vand.u32 2147483648, %v3773_v61  ;;  %vm3785_vm8 = vcmp.eq.f32.partialorder %v3773_v61, 0.0 }
0x2141   :  { %4511 = vrsqrt.f32 %v3772_v17  ;;  %vm3776_vm9 = vcmp.eq.f32.partialorder %v3772_v17, inf  ;;  %v3779_v4 = vand.u32 2147483648, %v3772_v17  ;;  %vm3778_vm10 = vcmp.eq.f32.partialorder %v3772_v17, 0.0 }
0x214a   :  { %v4510_v19 = vpop.eup %4509 }
0x214b   :  { %v4512_v22 = vpop.eup %4511  ;;  %v3782_v25 = vmul.f32 %v4510_v19, %v3773_v61 }
0x214c   :  { %v3775_v29 = vmul.f32 %v4512_v22, %v3772_v17 }
0x214d   :  { %v3784_v2 = vsel %vm3783_vm7, %v3773_v61, %v3782_v25 }
0x214e   :  { %v3787_v26 = vsel %vm3785_vm8, %v3786_v28, %v3784_v2  ;;  %v3777_v14 = vsel %vm3776_vm9, %v3772_v17, %v3775_v29 }
0x214f   :  { %v3795_v15 = vadd.f32 1e-06, %v3787_v26  ;;  %v3780_v16 = vsel %vm3778_vm10, %v3779_v4, %v3777_v14 }
0x2150   :  { %v3794_v27 = vadd.f32 1e-06, %v3780_v16 }
0x2151   :  { %4513 = vrcp.f32 %v3795_v15 }
0x2152   :  { %4515 = vrcp.f32 %v3794_v27 }
0x215b   :  { %v4514_v63 = vpop.eup %4513 }
0x215c   :  { %v4516_v24 = vpop.eup %4515  ;;  %v3799_v34 = vmul.f32 %v4514_v63, %v3793_v31 }
0x215d   :  { %v3797_v35 = vmul.f32 %v4516_v24, %v3792_v32 }
0x215e   :  { %v3805_v52 = vadd.f32 %v3907_v33, %v3799_v34 }
0x215f   :  { %v3804_v36 = vadd.f32 %v3907_v33, %v3797_v35 }
0x2160   :  { %3807 = vst.msk [vmem:[#allocation5 + $0x8] sm:$0xff] %vm76_vm0, %v3805_v52 }
0x2161   :  { %3806 = vst.msk [vmem:[#allocation5] sm:$0xff] %vm76_vm0, %v3804_v36 }
0x2162   :  { %4550 = shalt.err (!%p4547_p12)
}
0x2163   :  { %s4551_s18 = scalar_lea.hbm %s5106_s2, 256 }
0x2164   :  { %p4552_p13 = scmp.ne.s32.totalorder %s5106_s2, %s4551_s18  ;;  %p4555_p0 = scmp.lt.u32.totalorder %s4551_s18, %s5106_s2 }
0x2166   :  { %p4557_p1 = pnand %p4555_p0, %p4552_p13 }
0x2168   :  { %4560 = shalt.err (!%p4557_p1)
}
0x2169   :  { %3819 = dma.vmem_to_hbm [thread:$0]  %s3814_s14, 256, %s5106_s2, [#allocation4], %s4566_s19, %s4566_s19, %s4567_s20  }
0x216a   :  { %4563 = dma.done.wait [#allocation4], 256  }
0x216b   :  { %4564 = vsyncadd [#allocation4], 4294967040 }
0x216c   :  { %3823 = vsyncpa [#allocation3], 1 }
0x216d   :  { %3824 = vsyncpa [#allocation4], 1 }

</bundles_post_ra>
